<compile_context>
chip_gen: v7x
topology: tpu7x:2x2x1
jax: 0.10.0
libtpu: 0.0.40
codegen_flags: <defaults>
</compile_context>

<pallas_src>
import functools

import jax
import jax.numpy as jnp
from jax.experimental import pallas as pl
from jax.experimental.pallas import tpu as pltpu

N = 116            # number of nodes (adjacency is N x N); matches the 1/116 scaling
IN_FEATS = 116     # input feature dim (forced by weight1 shape (116, 64))
HIDDEN = 64        # hidden dim
OUT_FEATS = 116    # output dim (forced by weight2 shape (64, 116))
SCALE = 1.0 / 116.0

N_PAD = 128        # padded node axis
FIN_PAD = 128      # padded input-feature axis
HID_PAD = 128      # padded hidden axis
OUT_PAD = 128      # padded output-feature axis
N_PAD_ROWS = float(N_PAD - N)   # zero pad-rows per graph -> softmax denom correction


def prepare_params(weight1, weight2):
    """One-time parameter prep: fold the 1/116 propagation scale into the weights
    (scalar commutes through the matmuls and through ReLU since it is > 0) and
    zero-pad them to lane-dense 128x128 tiles."""
    w1 = weight1.astype(jnp.float32) * SCALE
    w2 = weight2.astype(jnp.float32) * SCALE
    w1p = jnp.pad(w1, ((0, FIN_PAD - IN_FEATS), (0, HID_PAD - HIDDEN)))
    w2p = jnp.pad(w2, ((0, HID_PAD - HIDDEN), (0, OUT_PAD - OUT_FEATS)))
    return w1p, w2p


def prepare_inputs(adjacency, features, tb):
    """One-time data prep (NOT per call): pad node/feature dims to 128 and the
    batch up to a multiple of the per-step tile `tb`.  Zero-padded graphs are
    harmless (zero adjacency -> finite uniform softmax) and get sliced off."""
    b = adjacency.shape[0]
    b_pad = ((b + tb - 1) // tb) * tb
    adj_p = jnp.pad(adjacency.astype(jnp.float32),
                    ((0, b_pad - b), (0, N_PAD - N), (0, N_PAD - N)))
    x_p = jnp.pad(features.astype(jnp.float32),
                  ((0, b_pad - b), (0, N_PAD - N), (0, FIN_PAD - IN_FEATS)))
    return adj_p, x_p


def choose_tile_batch(b, tb_max=8):
    """Keep >= 2 grid steps when possible (so the 'parallel' batch axis can be
    sharded across v7x's two TensorCores) while amortizing per-step overhead."""
    return max(1, min(tb_max, -(-b // 2)))


def gcn_kernel(adj_ref, x_ref, w1_ref, w2_ref, out_ref):
    adj = adj_ref[...]        # (TB, N_PAD, N_PAD)   padded rows/cols are zero
    x = x_ref[...]            # (TB, N_PAD, FIN_PAD) padded rows/cols are zero
    w1 = w1_ref[...]          # (FIN_PAD, HID_PAD),  SCALE pre-folded
    w2 = w2_ref[...]          # (HID_PAD, OUT_PAD),  SCALE pre-folded
    tb = adj.shape[0]

    # ---- Layer 1: shared-weight matmul, weight-stationary across all TB graphs ----
    s1 = jnp.dot(x.reshape(tb * N_PAD, FIN_PAD), w1,
                 preferred_element_type=jnp.float32).reshape(tb, N_PAD, HID_PAD)
    # Per-graph adjacency matmuls: TB independent 128-wide matmuls interleave on the MXU.
    h1 = jnp.maximum(
        jnp.einsum('bnm,bmh->bnh', adj, s1, preferred_element_type=jnp.float32), 0.0)

    # ---- Layer 2 ----
    s2 = jnp.dot(h1.reshape(tb * N_PAD, HID_PAD), w2,
                 preferred_element_type=jnp.float32).reshape(tb, N_PAD, OUT_PAD)
    h2 = jnp.einsum('bnm,bmh->bnh', adj, s2, preferred_element_type=jnp.float32)

    # ---- softmax over the node axis (axis=1 within each graph) ----
    # Padded node rows of h2 are exactly zero, so rather than masking them with
    # -inf we subtract their 12 * exp(-m) contribution from the denominator.
    m = jnp.max(h2, axis=1, keepdims=True)                    # (TB, 1, OUT_PAD)
    e = jnp.exp(h2 - m)
    denom = jnp.sum(e, axis=1, keepdims=True) - N_PAD_ROWS * jnp.exp(-m)
    out_ref[...] = e / denom                                   # lane-dense 128-wide store


@functools.partial(jax.jit, static_argnames=("tb",))
def gcn_forward_padded(adj_p, x_p, w1_p, w2_p, tb):
    """adj_p: (B_pad, 128, 128), x_p: (B_pad, 128, 128) from prepare_inputs;
    weights from prepare_params.  Returns the padded (B_pad, 128, 128) output
    slab — the consumer slices [:B, :116, :116]."""
    b_pad = adj_p.shape[0]
    grid = (b_pad // tb,)
    return pl.pallas_call(
        gcn_kernel,
        out_shape=jax.ShapeDtypeStruct((b_pad, N_PAD, OUT_PAD), jnp.float32),
        grid=grid,
        in_specs=[
            pl.BlockSpec((tb, N_PAD, N_PAD), lambda g: (g, 0, 0)),
            pl.BlockSpec((tb, N_PAD, FIN_PAD), lambda g: (g, 0, 0)),
            pl.BlockSpec((FIN_PAD, HID_PAD), lambda g: (0, 0)),   # resident weights
            pl.BlockSpec((HID_PAD, OUT_PAD), lambda g: (0, 0)),
        ],
        out_specs=pl.BlockSpec((tb, N_PAD, OUT_PAD), lambda g: (g, 0, 0)),
        compiler_params=pltpu.CompilerParams(
            dimension_semantics=("parallel",),   # shards grid steps across TCs on v7x
        ),
    )(adj_p, x_p, w1_p, w2_p)


def gcn_reference(adjacency_matrix, input_features, weight1, weight2):
    """Pure-JAX reference mirroring the PyTorch forward exactly (single graph)."""
    s1 = input_features @ weight1
    h1 = jnp.maximum((adjacency_matrix @ s1) * SCALE, 0.0)
    s2 = h1 @ weight2
    h2 = (adjacency_matrix @ s2) * SCALE
    return jax.nn.softmax(h2, axis=0)


if __name__ == "__main__":
    key = jax.random.PRNGKey(0)
    k_adj, k_x, k_w1, k_w2 = jax.random.split(key, 4)

    BATCH = 8  # batch of graphs sharing the module's weights

    adjacency_matrix = jax.random.normal(k_adj, (BATCH, N, N), dtype=jnp.float32)
    input_features = jax.random.normal(k_x, (BATCH, N, IN_FEATS), dtype=jnp.float32)
    weight1 = jax.random.normal(k_w1, (IN_FEATS, HIDDEN), dtype=jnp.float32)
    weight2 = jax.random.normal(k_w2, (HIDDEN, OUT_FEATS), dtype=jnp.float32)

    tb = choose_tile_batch(BATCH)                      # 4 -> grid=(2,)
    w1_p, w2_p = prepare_params(weight1, weight2)      # init-time, not per call
    adj_p, x_p = prepare_inputs(adjacency_matrix, input_features, tb)

    out_p = gcn_forward_padded(adj_p, x_p, w1_p, w2_p, tb)
    out_p = jax.block_until_ready(out_p)

    # Consumer-side slice of the lane-dense slab back to the real (B, 116, 116).
    out = out_p[:BATCH, :N, :OUT_FEATS]

    ref = jax.vmap(lambda a, x: gcn_reference(a, x, weight1, weight2))(
        adjacency_matrix, input_features)

    assert out.shape == (BATCH, N, OUT_FEATS)
    assert jnp.allclose(out, ref, atol=1e-5, rtol=1e-5), "mismatch vs reference"

    print("KERNEL_OK")
</pallas_src>

<mosaic_0001>
module attributes {stable_mosaic.version = 11 : i64} {
  func.func @gcn_kernel(%arg0: i32, %arg1: memref<4x128x128xf32, #tpu.memory_space<vmem>>, %arg2: memref<4x128x128xf32, #tpu.memory_space<vmem>>, %arg3: memref<128x128xf32, #tpu.memory_space<vmem>>, %arg4: memref<128x128xf32, #tpu.memory_space<vmem>>, %arg5: memref<4x128x128xf32, #tpu.memory_space<vmem>>) attributes {dimension_semantics = [#tpu.dimension_semantics<parallel>], iteration_bounds = array<i64: 2>, scalar_prefetch = 0 : i64, scratch_operands = 0 : i64, tpu.core_type = #tpu.core_type<tc>, window_params = [{transform_indices = @transform_0, window_bounds = array<i64: 4, 128, 128>}, {transform_indices = @transform_1, window_bounds = array<i64: 4, 128, 128>}, {pipeline_mode = #tpu.pipeline_mode<synchronous>, transform_indices = @transform_2, window_bounds = array<i64: 128, 128>}, {pipeline_mode = #tpu.pipeline_mode<synchronous>, transform_indices = @transform_3, window_bounds = array<i64: 128, 128>}, {transform_indices = @transform_4, window_bounds = array<i64: 4, 128, 128>}]} {
    %c0 = arith.constant 0 : index
    %c0_0 = arith.constant 0 : index
    %c0_1 = arith.constant 0 : index
    %0 = vector.load %arg1[%c0, %c0_0, %c0_1] : memref<4x128x128xf32, #tpu.memory_space<vmem>>, vector<4x128x128xf32>
    %c0_2 = arith.constant 0 : index
    %c0_3 = arith.constant 0 : index
    %c0_4 = arith.constant 0 : index
    %1 = vector.load %arg2[%c0_2, %c0_3, %c0_4] : memref<4x128x128xf32, #tpu.memory_space<vmem>>, vector<4x128x128xf32>
    %c0_5 = arith.constant 0 : index
    %c0_6 = arith.constant 0 : index
    %2 = vector.load %arg3[%c0_5, %c0_6] : memref<128x128xf32, #tpu.memory_space<vmem>>, vector<128x128xf32>
    %c0_7 = arith.constant 0 : index
    %c0_8 = arith.constant 0 : index
    %3 = vector.load %arg4[%c0_7, %c0_8] : memref<128x128xf32, #tpu.memory_space<vmem>>, vector<128x128xf32>
    %4 = vector.shape_cast %1 : vector<4x128x128xf32> to vector<512x128xf32>
    %cst = arith.constant dense<0.000000e+00> : vector<512x128xf32>
    %5 = tpu.matmul %4, %2, %cst {dimension_numbers = #tpu.dot_dimension_numbers<[1], [0], [0], [1], [0, 0, 1, 1], [], []>} : vector<512x128xf32>, vector<128x128xf32>, vector<512x128xf32> -> vector<512x128xf32>
    %6 = vector.shape_cast %5 : vector<512x128xf32> to vector<4x128x128xf32>
    "tpu.trace_start"() <{level = 10 : i32, message = "bnm,bmh->bnh"}> : () -> ()
    %cst_9 = arith.constant dense<0.000000e+00> : vector<4x128x128xf32>
    %7 = tpu.matmul %0, %6, %cst_9 {dimension_numbers = #tpu.dot_dimension_numbers<[2], [1], [1], [2], [0, 0, 0, 1, 1, 2], [0], [0]>} : vector<4x128x128xf32>, vector<4x128x128xf32>, vector<4x128x128xf32> -> vector<4x128x128xf32>
    "tpu.trace_stop"() : () -> ()
    %cst_10 = arith.constant 0.000000e+00 : f32
    %8 = vector.broadcast %cst_10 : f32 to vector<4x128x128xf32>
    %9 = arith.maximumf %7, %8 : vector<4x128x128xf32>
    %10 = vector.shape_cast %9 : vector<4x128x128xf32> to vector<512x128xf32>
    %cst_11 = arith.constant dense<0.000000e+00> : vector<512x128xf32>
    %11 = tpu.matmul %10, %3, %cst_11 {dimension_numbers = #tpu.dot_dimension_numbers<[1], [0], [0], [1], [0, 0, 1, 1], [], []>} : vector<512x128xf32>, vector<128x128xf32>, vector<512x128xf32> -> vector<512x128xf32>
    %12 = vector.shape_cast %11 : vector<512x128xf32> to vector<4x128x128xf32>
    "tpu.trace_start"() <{level = 10 : i32, message = "bnm,bmh->bnh"}> : () -> ()
    %cst_12 = arith.constant dense<0.000000e+00> : vector<4x128x128xf32>
    %13 = tpu.matmul %0, %12, %cst_12 {dimension_numbers = #tpu.dot_dimension_numbers<[2], [1], [1], [2], [0, 0, 0, 1, 1, 2], [0], [0]>} : vector<4x128x128xf32>, vector<4x128x128xf32>, vector<4x128x128xf32> -> vector<4x128x128xf32>
    "tpu.trace_stop"() : () -> ()
    %cst_13 = arith.constant dense<0xFF800000> : vector<4x128xf32>
    %14 = vector.multi_reduction <maximumf>, %13, %cst_13 [1] : vector<4x128x128xf32> to vector<4x128xf32>
    %15 = vector.shape_cast %14 : vector<4x128xf32> to vector<4x1x128xf32>
    %16 = vector.broadcast %15 : vector<4x1x128xf32> to vector<4x128x128xf32>
    %17 = arith.subf %13, %16 : vector<4x128x128xf32>
    %18 = math.exp %17 : vector<4x128x128xf32>
    %cst_14 = arith.constant dense<0.000000e+00> : vector<4x128xf32>
    %19 = vector.multi_reduction <add>, %18, %cst_14 [1] : vector<4x128x128xf32> to vector<4x128xf32>
    %20 = vector.shape_cast %19 : vector<4x128xf32> to vector<4x1x128xf32>
    %cst_15 = arith.constant 0.000000e+00 : f32
    %21 = vector.broadcast %cst_15 : f32 to vector<4x1x128xf32>
    %22 = arith.subf %21, %15 : vector<4x1x128xf32>
    %23 = math.exp %22 : vector<4x1x128xf32>
    %cst_16 = arith.constant 1.200000e+01 : f32
    %24 = vector.broadcast %cst_16 : f32 to vector<4x1x128xf32>
    %25 = arith.mulf %24, %23 : vector<4x1x128xf32>
    %26 = arith.subf %20, %25 : vector<4x1x128xf32>
    %27 = vector.broadcast %26 : vector<4x1x128xf32> to vector<4x128x128xf32>
    %28 = arith.divf %18, %27 : vector<4x128x128xf32>
    %c0_17 = arith.constant 0 : index
    %c0_18 = arith.constant 0 : index
    %c0_19 = arith.constant 0 : index
    %29 = vector.load %arg5[%c0_17, %c0_18, %c0_19] : memref<4x128x128xf32, #tpu.memory_space<vmem>>, vector<4x128x128xf32>
    tpu.vector_store %arg5[%c0_17, %c0_18, %c0_19], %28 {strides = array<i32>} : memref<4x128x128xf32, #tpu.memory_space<vmem>>, vector<4x128x128xf32>,
    return
  }
  func.func @transform_0(%arg0: i32) -> (i32, i32, i32) {
    %c0_i32 = arith.constant 0 : i32
    %c0_i32_0 = arith.constant 0 : i32
    %c0_i32_1 = arith.constant 0 : i32
    return %arg0, %c0_i32, %c0_i32_0 : i32, i32, i32
  }
  func.func @transform_1(%arg0: i32) -> (i32, i32, i32) {
    %c0_i32 = arith.constant 0 : i32
    %c0_i32_0 = arith.constant 0 : i32
    %c0_i32_1 = arith.constant 0 : i32
    return %arg0, %c0_i32, %c0_i32_0 : i32, i32, i32
  }
  func.func @transform_2(%arg0: i32) -> (i32, i32) {
    %c0_i32 = arith.constant 0 : i32
    %c0_i32_0 = arith.constant 0 : i32
    %c0_i32_1 = arith.constant 0 : i32
    return %c0_i32, %c0_i32_0 : i32, i32
  }
  func.func @transform_3(%arg0: i32) -> (i32, i32) {
    %c0_i32 = arith.constant 0 : i32
    %c0_i32_0 = arith.constant 0 : i32
    %c0_i32_1 = arith.constant 0 : i32
    return %c0_i32, %c0_i32_0 : i32, i32
  }
  func.func @transform_4(%arg0: i32) -> (i32, i32, i32) {
    %c0_i32 = arith.constant 0 : i32
    %c0_i32_0 = arith.constant 0 : i32
    %c0_i32_1 = arith.constant 0 : i32
    return %arg0, %c0_i32, %c0_i32_0 : i32, i32, i32
  }
}

</mosaic_0001>

<bundles_post_ra>
// kernel: gcn_forward_padded.1
= control target key start
LH: loop header
LB: loop body
LE: loop exit
PB: predicated region body
PF: predicated region fallthrough
CT: control target
= control target key end

     0   :  { %s6412_s0 = inlined_call_operand.hbm [shape: f32[8,128,128], index: 0, kind: input, shape index: {}]   ;;  %s6413_s1 = inlined_call_operand.hbm [shape: f32[8,128,128], index: 1, kind: input, shape index: {}]   ;;  %s6414_s2 = inlined_call_operand.hbm [shape: f32[128,128], index: 2, kind: input, shape index: {}]   ;;  %s6415_s3 = inlined_call_operand.hbm [shape: f32[128,128], index: 3, kind: input, shape index: {}]   ;;  %s6416_s4 = inlined_call_operand.hbm [shape: f32[8,128,128], index: 4, kind: output, shape index: {}]  }
   0x1   :  { %6444 = sst [smem:[#allocation31_spill]] %s6412_s0 }
   0x2   :  { %9 = vsyncpa [#allocation3], 0 }
   0x3   :  { %11 = vsyncpa [#allocation3 + $0x1], 0 }
   0x4   :  { %12 = vsyncpa [#allocation6], 0 }
   0x5   :  { %14 = vsyncpa [#allocation6 + $0x1], 0 }
   0x6   :  { %15 = vsyncpa [#allocation9], 0 }
   0x7   :  { %16 = vsyncpa [#allocation4], 0 }
   0x8   :  { %18 = vsyncpa [#allocation4 + $0x1], 0  ;;  %s5007_s15 = smov 0   ;;  %s5009_s16 = smov 0  }
   0x9   :  { %s5011_s17 = smov 0   ;;  %s5013_s18 = smov 0  }
   0xa LB: > { %s5028_s19 = sadd.s32 4294967295, %s4971_s18   ;;  %s3086_s20 = sadd.s32 4294967294, %s4971_s18   ;;  %s4971_s18 = sphi %s5013_s18, %s6515_s18   ;;  %s4967_s17 = sphi %s5011_s17, %s6514_s17   ;;  %s4963_s16 = sphi %s5009_s16, %s6513_s16   ;;  %s4959_s15 = sphi %s5007_s15, %s6512_s15  }
   0xb   : > { %p44_p0 = scmp.ne.s32.totalorder %s4963_s16, %s4959_s15  ;;  %p6417_p1 = scmp.eq.s32.totalorder %s5028_s19, 0 }
   0xc   : > { %p142_p3 = scmp.eq.s32.totalorder %s3086_s20, 1  ;;  %p3087_p5 = scmp.ge.s32.totalorder %s4971_s18, 1 }
   0xd   : > { %p5037_p4 = por %p6417_p1, %p44_p0  ;;  %p149_p7 = scmp.lt.s32.totalorder %s4971_s18, 3 }
   0xe   : > { %p5042_p6 = por %p142_p3, %p44_p0  ;;  %s4973_s24 = smov [#allocation7]  }
   0xf   : > { %s6445_s21 = scalar_select %p5037_p4, 1, 0 }
  0x10   : > { %s6446_s22 = scalar_select %p5042_p6, 1, 0 }
  0x11   : > { %p5047_p8 = pnand %p3087_p5, %p149_p7  ;;  %s161_s25 = sshll.u32 %s4973_s24, 4  ;;  %s5051_s25 = int_to_ptr.vmem [resolvable:$true] %s161_s25 }
  0x12   : > { %s4974_s27 = smov [#allocation8]   ;;  %s4777_s5 = scalar_lea.hbm %s6414_s2, 2048 }
  0x13   : > { %p4571_p9 = pneg %p5047_p8  ;;  %s174_s28 = sshll.u32 %s4974_s27, 4  ;;  %s5062_s28 = int_to_ptr.vmem [resolvable:$true] %s174_s28 }
  0x14   : > { %p4778_p12 = scmp.ne.s32.totalorder %s6414_s2, %s4777_s5  ;;  %p4784_p5 = scmp.lt.u32.totalorder %s4777_s5, %s6414_s2 }
  0x15   : > { %p5058_p11 = pnand %p4571_p9, %p6417_p1 }
  0x17   : > { %p4779_p13 = pneg %p5058_p11 }
  0x19   : > { %p4780_p0 = pnand %p4779_p13, %p4778_p12 }
  0x1b   : > { %p4781_p3 = pneg %p4780_p0 }
  0x1d   : > { %p4786_p7 = pnand %p4784_p5, %p4781_p3 }
  0x1f   : > { %4789 = shalt.err (!%p4786_p7)
}
  0x20   : > { %s4790_s10 = scalar_lea.vmem %s5051_s25, 2048  ;;  %p4798_p2 = scmp.lt.s32.totalorder %s5051_s25, %s5051_s25 }
  0x21   : > { %p4791_p9 = scmp.ne.s32.totalorder %s5051_s25, %s4790_s10  ;;  %p4799_p12 = scmp.lt.s32.totalorder %s4790_s10, %s4790_s10 }
  0x23   : > { %p4793_p10 = pnand %p4791_p9, %p4779_p13  ;;  %p4800_p0 = por %p4799_p12, %p4798_p2 }
  0x25   : > { %p4794_p1 = pneg %p4793_p10 }
  0x27   : > { %p4801_p6 = pnand %p4800_p0, %p4794_p1 }
  0x29   : > { %4804 = shalt.err (!%p4801_p6)
}
  0x2a   : > { %s6418_s11 = smov 128   ;;  %s6420_s12 = smov 8  }
  0x2b   : > { %4574 = dma.hbm_to_vmem [thread:$0]  (!%p5058_p11), %s6414_s2, 2048, %s5051_s25, [#allocation6], %s6418_s11, %s6418_s11, %s6420_s12  }
  0x2c   : > { %s4805_s27 = scalar_lea.hbm %s6415_s3, 2048 }
  0x2d   : > { %p4806_p1 = scmp.ne.s32.totalorder %s6415_s3, %s4805_s27  ;;  %p4812_p10 = scmp.lt.u32.totalorder %s4805_s27, %s6415_s3 }
  0x2f   : > { %p4808_p2 = pnand %p4806_p1, %p4779_p13 }
  0x31   : > { %p4809_p6 = pneg %p4808_p2 }
  0x33   : > { %p4814_p3 = pnand %p4812_p10, %p4809_p6 }
  0x35   : > { %4817 = shalt.err (!%p4814_p3)
}
  0x36   : > { %s4818_s25 = scalar_lea.vmem %s5062_s28, 2048  ;;  %p4826_p12 = scmp.lt.s32.totalorder %s5062_s28, %s5062_s28 }
  0x37   : > { %p4819_p5 = scmp.ne.s32.totalorder %s5062_s28, %s4818_s25  ;;  %p4827_p0 = scmp.lt.s32.totalorder %s4818_s25, %s4818_s25 }
  0x39   : > { %p4821_p7 = pnand %p4819_p5, %p4779_p13  ;;  %p4828_p1 = por %p4827_p0, %p4826_p12 }
  0x3b   : > { %p4822_p9 = pneg %p4821_p7 }
  0x3d   : > { %p4829_p2 = pnand %p4828_p1, %p4822_p9 }
  0x3f   : > { %4832 = shalt.err (!%p4829_p2)
}
  0x40   : > { %4577 = dma.hbm_to_vmem [thread:$0]  (!%p5058_p11), %s6415_s3, 2048, %s5062_s28, [#allocation9], %s6418_s11, %s6418_s11, %s6420_s12  }
  0x41   : > { %s5123_s26 = sadd.s32 1, %s4971_s18   ;;  %s31_s9 = sadd.s32 1, %s4967_s17 }
  0x42   : > { %s28_s10 = ssub.s32 %s4971_s18, %s5123_s26  ;;  %p38_p13 = scmp.ne.s32.totalorder %s4967_s17, %s4963_s16 }
  0x43   : > { %p29_p6 = scmp.eq.s32.totalorder %s28_s10, 0  ;;  %p39_p10 = scmp.eq.s32.totalorder %s4971_s18, 0 }
  0x44   : > { %p6449_p3 = scmp.eq.s32.totalorder %s5028_s19, 1  ;;  %p4591_p7 = scmp.lt.s32.totalorder %s4971_s18, 2 }
  0x45   : > { %s5139_s14 = scalar_select %p29_p6, %s4967_s17, %s31_s9  }
  0x46   : > { %p5133_p5 = por %p6449_p3, %p38_p13  ;;  %p40_p9 = por %p39_p10, %p38_p13 }
  0x47   : > { %s188_s20 = sand.u32 1, %s4967_s17   ;;  %s3112_s28 = sshll.u32 %s4971_s18, 13 }
  0x48   : > { %s6450_s13 = scalar_select %p5133_p5, 1, 0 }
  0x49   : > { %s3091_s24 = sshll.u32 %s188_s20, 9  ;;  %s6451_s0 = sld [smem:[#allocation31_spill]] }
  0x4a   : > { %s192_s5 = scalar_lea.vmem [#allocation2], %s3091_s24  ;;  %p5150_p11 = pnand %p4591_p7, %p40_p9 }
  0x4b   : > { %s200_s6 = sshll.u32 %s192_s5, 4  ;;  %s5157_s9 = scalar_lea.hbm %s6413_s1, %s3112_s28  ;;  %s5148_s6 = int_to_ptr.vmem [resolvable:$true] %s200_s6 }
  0x4c   : > { %s214_s10 = scalar_lea.vmem [#allocation5], %s3091_s24  ;;  %s5161_s29 = scalar_lea.sflag [#allocation3], %s188_s20 }
  0x4d   : > { %s5159_s27 = sshll.u32 %s214_s10, 4  ;;  %p4835_p0 = pneg %p5150_p11  ;;  %s5193_s27 = int_to_ptr.vmem [resolvable:$true] %s5159_s27 }
  0x4f   : > { %s5146_s30 = scalar_lea.hbm %s6451_s0, %s3112_s28  ;;  %s4838_s7 = scalar_lea.hbm %s6451_s0, 16384 }
  0x50   : > { %s4833_s5 = scalar_lea.hbm %s5146_s30, 8192  ;;  %p4839_p13 = scmp.lt.u32.totalorder %s5146_s30, %s6451_s0 }
  0x51   : > { %p4834_p12 = scmp.ne.s32.totalorder %s5146_s30, %s4833_s5  ;;  %p4840_p6 = scmp.lt.u32.totalorder %s4838_s7, %s4833_s5 }
  0x52   : > { %p4842_p3 = scmp.lt.u32.totalorder %s4833_s5, %s5146_s30 }
  0x53   : > { %p4836_p1 = pnand %p4835_p0, %p4834_p12  ;;  %p4841_p10 = por %p4840_p6, %p4839_p13 }
  0x55   : > { %p4837_p2 = pneg %p4836_p1  ;;  %p4843_p7 = por %p4842_p3, %p4841_p10 }
  0x57   : > { %p4844_p9 = pnand %p4843_p7, %p4837_p2 }
  0x59   : > { %4847 = shalt.err (!%p4844_p9)
}
  0x5a   : > { %s4848_s20 = scalar_lea.vmem %s5148_s6, 8192  ;;  %s4977_s11 = smov [#allocation2]  }
  0x5b   : > { %p4849_p12 = scmp.ne.s32.totalorder %s5148_s6, %s4848_s20  ;;  %s4853_s12 = sshll.u32 %s4977_s11, 4  ;;  %s4854_s12 = int_to_ptr.vmem [resolvable:$false] %s4853_s12 }
  0x5c   : > { %s4855_s24 = scalar_lea.vmem %s4854_s12, 16384  ;;  %p4856_p4 = scmp.lt.s32.totalorder %s5148_s6, %s4854_s12 }
  0x5d   : > { %p4851_p1 = pnand %p4849_p12, %p4835_p0  ;;  %p4857_p13 = scmp.lt.s32.totalorder %s4855_s24, %s4848_s20 }
  0x5f   : > { %p4852_p5 = pneg %p4851_p1  ;;  %p4858_p6 = por %p4857_p13, %p4856_p4 }
  0x61   : > { %p4859_p10 = pnand %p4858_p6, %p4852_p5 }
  0x63   : > { %4862 = shalt.err (!%p4859_p10)
}
  0x64   : > { %s6453_s10 = smov 8   ;;  %s6454_s5 = smov 128  }
  0x65   : > { %4581 = dma.hbm_to_vmem [thread:$0]  (!%p5150_p11), %s5146_s30, 8192, %s5148_s6, %s5161_s29, %s6454_s5, %s6454_s5, %s6453_s10  }
  0x66   : > { %s210_s7 = sand.u32 1, %s4971_s18   ;;  %s4863_s28 = scalar_lea.hbm %s5157_s9, 8192 }
  0x67   : > { %s5196_s8 = scalar_lea.sflag [#allocation6], %s210_s7  ;;  %p4864_p4 = scmp.ne.s32.totalorder %s5157_s9, %s4863_s28 }
  0x68   : > { %s4868_s12 = scalar_lea.hbm %s6413_s1, 16384  ;;  %p4869_p3 = scmp.lt.u32.totalorder %s5157_s9, %s6413_s1 }
  0x69   : > { %p4866_p5 = pnand %p4864_p4, %p4835_p0  ;;  %p4870_p7 = scmp.lt.u32.totalorder %s4868_s12, %s4863_s28 }
  0x6a   : > { %p4872_p12 = scmp.lt.u32.totalorder %s4863_s28, %s5157_s9 }
  0x6b   : > { %p4867_p2 = pneg %p4866_p5  ;;  %p4871_p9 = por %p4870_p7, %p4869_p3 }
  0x6d   : > { %p4873_p1 = por %p4872_p12, %p4871_p9 }
  0x6f   : > { %p4874_p13 = pnand %p4873_p1, %p4867_p2 }
  0x71   : > { %4877 = shalt.err (!%p4874_p13)
}
  0x72   : > { %s4878_s30 = scalar_lea.vmem %s5193_s27, 8192  ;;  %s4978_s6 = smov [#allocation5]  }
  0x73   : > { %p4879_p6 = scmp.ne.s32.totalorder %s5193_s27, %s4878_s30  ;;  %s4883_s29 = sshll.u32 %s4978_s6, 4  ;;  %s4884_s29 = int_to_ptr.vmem [resolvable:$false] %s4883_s29 }
  0x74   : > { %s4885_s0 = scalar_lea.vmem %s4884_s29, 16384  ;;  %p4886_p5 = scmp.lt.s32.totalorder %s5193_s27, %s4884_s29 }
  0x75   : > { %p4881_p10 = pnand %p4879_p6, %p4835_p0  ;;  %p4887_p3 = scmp.lt.s32.totalorder %s4885_s0, %s4878_s30 }
  0x77   : > { %p4882_p4 = pneg %p4881_p10  ;;  %p4888_p7 = por %p4887_p3, %p4886_p5 }
  0x79   : > { %p4889_p9 = pnand %p4888_p7, %p4882_p4 }
  0x7b   : > { %4892 = shalt.err (!%p4889_p9)
}
  0x7c   : > { %4584 = dma.hbm_to_vmem [thread:$0]  (!%p5150_p11), %s5157_s9, 8192, %s5193_s27, %s5196_s8, %s6454_s5, %s6454_s5, %s6453_s10  }
  0x7d   : > { %234 = sbr.rel (%p5047_p8) target bundleno = 1361 (0x551), region = 36 }
  0x84   : > { %s5228_s7 = sand.u32 1, %s4963_s16   ;;  %p6455_p0 = scmp.ne.s32.totalorder %s6445_s21, 0 }
  0x85   : > { %s5231_s28 = sshll.u32 %s5228_s7, 9  ;;  %s237_s25 = scalar_lea.sflag [#allocation3], %s5228_s7 }
  0x86   : > { %s5235_s20 = scalar_lea.vmem [#allocation2], %s5231_s28 }
  0x87   : > { %4938 = dma.done.wait (%p6455_p0), %s237_s25, 8192  }
  0x88   : > { %4940 = vsyncadd (%p6455_p0), %s237_s25, 4294959104  ;;  %s245_s23 = sand.u32 1, %s5028_s19   ;;  %s5243_s27 = scalar_lea.vmem [#allocation5], %s5231_s28 }
  0x89   : > { %s246_s9 = scalar_lea.sflag [#allocation6], %s245_s23 }
  0x8a   : > { %4942 = dma.done.wait (%p6455_p0), %s246_s9, 8192  }
  0x8b   : > { %4944 = vsyncadd (%p6455_p0), %s246_s9, 4294959104  ;;  %p6456_p8 = scmp.eq.s32.totalorder %s5028_s19, 0 }
  0x8d   : > { %4946 = dma.done.wait (%p6456_p8), [#allocation6], 2048   ;;  %p6457_p11 = pmov %p6456_p8 }
  0x8e   : > { %p6458_p2 = pmov %p6456_p8 }
  0x8f   : > { %4948 = vsyncadd (%p6457_p11), [#allocation6], 4294965248 }
  0x90   : > { %4950 = dma.done.wait (%p6458_p2), [#allocation9], 2048   ;;  %p6459_p12 = pmov %p6458_p2 }
  0x91   : > { %v418_v0 = vld [vmem:[#allocation7] sm:$0xff]  ;;  %v419_v1 = vld [vmem:[#allocation7 + $0x8] sm:$0xff]  ;;  %v420_v2 = vld [vmem:[#allocation7 + $0x10] sm:$0xff]  ;;  %s6014_s21 = scalar_lea.vmem [#allocation10], %s5231_s28  ;;  %s3116_s10 = sshll.u32 %s5028_s19, 13 }
  0x92   : > { %4952 = vsyncadd (%p6459_p12), [#allocation9], 4294965248  ;;  %v4237_v3 = vpack.c.bf16 %v419_v1, %v418_v0  ;;  %v421_v4 = vld [vmem:[#allocation7 + $0x18] sm:$0xff]  ;;  %v422_v6 = vld [vmem:[#allocation7 + $0x20] sm:$0xff]  ;;  %s2971_s5 = sshll.u32 %s6014_s21, 4  ;;  %s6353_s11 = scalar_lea.hbm %s6416_s4, %s3116_s10  ;;  %s6355_s5 = int_to_ptr.vmem [resolvable:$true] %s2971_s5 }
  0x93   : > { %v4241_v5 = vpack.c.bf16 %v421_v4, %v420_v2  ;;  %v423_v7 = vld [vmem:[#allocation7 + $0x28] sm:$0xff]  ;;  %v354_v9 = vld [vmem:[%s5243_s27] sm:$0xff]  ;;  %v424_v10 = vld [vmem:[#allocation7 + $0x30] sm:$0xff]  ;;  %s2957_s12 = scalar_lea.sflag [#allocation4], %s5228_s7  ;;  %s4893_s24 = scalar_lea.vmem %s6355_s5, 8192 }
  0x94   : > { %4238 = vmatprep.subr.bf16.mxu0 %v4237_v3  ;;  %v4245_v8 = vpack.c.bf16 %v423_v7, %v422_v6  ;;  %v425_v11 = vld [vmem:[#allocation7 + $0x38] sm:$0xff]  ;;  %3565 = vmatprep.mubr.f32.mxu0 %v354_v9  ;;  %v426_v13 = vld [vmem:[#allocation7 + $0x40] sm:$0xff]  ;;  %v427_v14 = vld [vmem:[#allocation7 + $0x48] sm:$0xff]  ;;  %p4894_p1 = scmp.ne.s32.totalorder %s6355_s5, %s4893_s24  ;;  %p6509_p13 = scmp.ne.s32.totalorder %s6450_s13, 0 }
  0x95   : > { %4240 = vmatpush3.bf16.msra.mxu0 %v4237_v3  ;;  %v4249_v12 = vpack.c.bf16 %v425_v11, %v424_v10  ;;  %v4253_v15 = vpack.c.bf16 %v427_v14, %v426_v13  ;;  %v428_v16 = vld [vmem:[#allocation7 + $0x50] sm:$0xff]  ;;  %v429_v17 = vld [vmem:[#allocation7 + $0x58] sm:$0xff]  ;;  %v430_v19 = vld [vmem:[#allocation7 + $0x60] sm:$0xff]  ;;  %s4979_s30 = smov [#allocation10]  }
  0x96   : > { %4242 = vmatprep.subr.bf16.mxu0 %v4241_v5  ;;  %v4257_v18 = vpack.c.bf16 %v429_v17, %v428_v16  ;;  %v431_v20 = vld [vmem:[#allocation7 + $0x68] sm:$0xff]  ;;  %v432_v22 = vld [vmem:[#allocation7 + $0x70] sm:$0xff]  ;;  %v433_v23 = vld [vmem:[#allocation7 + $0x78] sm:$0xff]  ;;  %p4895_p6 = pnand %p4894_p1, %p6509_p13  ;;  %s4897_s6 = sshll.u32 %s4979_s30, 4  ;;  %s4898_s6 = int_to_ptr.vmem [resolvable:$false] %s4897_s6 }
  0x97   : > { %v4261_v21 = vpack.c.bf16 %v431_v20, %v430_v19  ;;  %v4265_v24 = vpack.c.bf16 %v433_v23, %v432_v22  ;;  %v355_v25 = vld [vmem:[%s5243_s27 + $0x8] sm:$0xff]  ;;  %v356_v26 = vld [vmem:[%s5243_s27 + $0x10] sm:$0xff]  ;;  %v357_v27 = vld [vmem:[%s5243_s27 + $0x18] sm:$0xff]  ;;  %s4899_s29 = scalar_lea.vmem %s4898_s6, 16384  ;;  %p4900_p4 = scmp.lt.s32.totalorder %s6355_s5, %s4898_s6 }
  0x98   : > { %v358_v28 = vld [vmem:[%s5243_s27 + $0x20] sm:$0xff]  ;;  %v359_v29 = vld [vmem:[%s5243_s27 + $0x28] sm:$0xff]  ;;  %v360_v30 = vld [vmem:[%s5243_s27 + $0x30] sm:$0xff]  ;;  %p4896_p10 = pneg %p4895_p6  ;;  %p4901_p5 = scmp.lt.s32.totalorder %s4899_s29, %s4893_s24 }
  0x99   : > { %4244 = vmatpush3.bf16.msra.mxu0 %v4241_v5  ;;  %v361_v31 = vld [vmem:[%s5243_s27 + $0x38] sm:$0xff]  ;;  %v362_v32 = vld [vmem:[%s5243_s27 + $0x40] sm:$0xff]  ;;  %v363_v33 = vld [vmem:[%s5243_s27 + $0x48] sm:$0xff] }
  0x9a   : > { %4246 = vmatprep.subr.bf16.mxu0 %v4245_v8  ;;  %v364_v34 = vld [vmem:[%s5243_s27 + $0x50] sm:$0xff]  ;;  %v365_v35 = vld [vmem:[%s5243_s27 + $0x58] sm:$0xff]  ;;  %v366_v36 = vld [vmem:[%s5243_s27 + $0x60] sm:$0xff]  ;;  %p4902_p3 = por %p4901_p5, %p4900_p4 }
  0x9b   : > { %v367_v37 = vld [vmem:[%s5243_s27 + $0x68] sm:$0xff]  ;;  %v368_v38 = vld [vmem:[%s5243_s27 + $0x70] sm:$0xff]  ;;  %v369_v39 = vld [vmem:[%s5243_s27 + $0x78] sm:$0xff] }
  0x9c   : > { %v370_v40 = vld [vmem:[%s5243_s27 + $0x80] sm:$0xff]  ;;  %v371_v41 = vld [vmem:[%s5243_s27 + $0x88] sm:$0xff]  ;;  %v372_v42 = vld [vmem:[%s5243_s27 + $0x90] sm:$0xff]  ;;  %p4903_p7 = pnand %p4902_p3, %p4896_p10 }
  0x9d   : > { %4248 = vmatpush3.bf16.msra.mxu0 %v4245_v8  ;;  %v373_v43 = vld [vmem:[%s5243_s27 + $0x98] sm:$0xff]  ;;  %v374_v44 = vld [vmem:[%s5243_s27 + $0xa0] sm:$0xff]  ;;  %v375_v45 = vld [vmem:[%s5243_s27 + $0xa8] sm:$0xff] }
  0x9e   : > { %4250 = vmatprep.subr.bf16.mxu0 %v4249_v12  ;;  %v376_v46 = vld [vmem:[%s5243_s27 + $0xb0] sm:$0xff]  ;;  %v377_v47 = vld [vmem:[%s5243_s27 + $0xb8] sm:$0xff]  ;;  %v378_v48 = vld [vmem:[%s5243_s27 + $0xc0] sm:$0xff] }
  0x9f   : > { %v379_v49 = vld [vmem:[%s5243_s27 + $0xc8] sm:$0xff]  ;;  %v380_v50 = vld [vmem:[%s5243_s27 + $0xd0] sm:$0xff]  ;;  %v381_v51 = vld [vmem:[%s5243_s27 + $0xd8] sm:$0xff] }
  0xa0   : > { %v382_v52 = vld [vmem:[%s5243_s27 + $0xe0] sm:$0xff]  ;;  %v383_v53 = vld [vmem:[%s5243_s27 + $0xe8] sm:$0xff]  ;;  %v384_v54 = vld [vmem:[%s5243_s27 + $0xf0] sm:$0xff] }
  0xa1   : > { %4252 = vmatpush3.bf16.msra.mxu0 %v4249_v12  ;;  %v385_v55 = vld [vmem:[%s5243_s27 + $0xf8] sm:$0xff]  ;;  %v386_v56 = vld [vmem:[%s5243_s27 + $0x100] sm:$0xff]  ;;  %v387_v57 = vld [vmem:[%s5243_s27 + $0x108] sm:$0xff] }
  0xa2   : > { %4254 = vmatprep.subr.bf16.mxu0 %v4253_v15  ;;  %v388_v58 = vld [vmem:[%s5243_s27 + $0x110] sm:$0xff]  ;;  %v389_v59 = vld [vmem:[%s5243_s27 + $0x118] sm:$0xff]  ;;  %v390_v60 = vld [vmem:[%s5243_s27 + $0x120] sm:$0xff] }
  0xa3   : > { %v391_v61 = vld [vmem:[%s5243_s27 + $0x128] sm:$0xff]  ;;  %v392_v62 = vld [vmem:[%s5243_s27 + $0x130] sm:$0xff]  ;;  %v393_v63 = vld [vmem:[%s5243_s27 + $0x138] sm:$0xff] }
  0xa4   : > { %v394_v0 = vld [vmem:[%s5243_s27 + $0x140] sm:$0xff]  ;;  %v395_v1 = vld [vmem:[%s5243_s27 + $0x148] sm:$0xff]  ;;  %v396_v2 = vld [vmem:[%s5243_s27 + $0x150] sm:$0xff] }
  0xa5   : > { %4256 = vmatpush3.bf16.msra.mxu0 %v4253_v15  ;;  %v397_v3 = vld [vmem:[%s5243_s27 + $0x158] sm:$0xff]  ;;  %v398_v4 = vld [vmem:[%s5243_s27 + $0x160] sm:$0xff]  ;;  %v399_v5 = vld [vmem:[%s5243_s27 + $0x168] sm:$0xff] }
  0xa6   : > { %4258 = vmatprep.subr.bf16.mxu0 %v4257_v18  ;;  %v400_v6 = vld [vmem:[%s5243_s27 + $0x170] sm:$0xff]  ;;  %v401_v7 = vld [vmem:[%s5243_s27 + $0x178] sm:$0xff]  ;;  %v402_v8 = vld [vmem:[%s5243_s27 + $0x180] sm:$0xff] }
  0xa7   : > { %v403_v9 = vld [vmem:[%s5243_s27 + $0x188] sm:$0xff]  ;;  %v404_v10 = vld [vmem:[%s5243_s27 + $0x190] sm:$0xff]  ;;  %v405_v11 = vld [vmem:[%s5243_s27 + $0x198] sm:$0xff] }
  0xa8   : > { %v406_v12 = vld [vmem:[%s5243_s27 + $0x1a0] sm:$0xff]  ;;  %v407_v13 = vld [vmem:[%s5243_s27 + $0x1a8] sm:$0xff]  ;;  %v408_v14 = vld [vmem:[%s5243_s27 + $0x1b0] sm:$0xff] }
  0xa9   : > { %4260 = vmatpush3.bf16.msra.mxu0 %v4257_v18  ;;  %v409_v15 = vld [vmem:[%s5243_s27 + $0x1b8] sm:$0xff]  ;;  %v410_v16 = vld [vmem:[%s5243_s27 + $0x1c0] sm:$0xff]  ;;  %v411_v17 = vld [vmem:[%s5243_s27 + $0x1c8] sm:$0xff] }
  0xaa   : > { %4262 = vmatprep.subr.bf16.mxu0 %v4261_v21  ;;  %v412_v18 = vld [vmem:[%s5243_s27 + $0x1d0] sm:$0xff]  ;;  %v413_v19 = vld [vmem:[%s5243_s27 + $0x1d8] sm:$0xff]  ;;  %v414_v20 = vld [vmem:[%s5243_s27 + $0x1e0] sm:$0xff] }
  0xab   : > { %v5320_v22 = vld [vmem:[%s5235_s20] sm:$0xff]  ;;  %v416_v23 = vld [vmem:[%s5243_s27 + $0x1f0] sm:$0xff] }
  0xac   : > { %3693 = vmatprep.mubr.f32.mxu1 %v5320_v22 }
  0xad   : > { %4264 = vmatpush3.bf16.msra.mxu0 %v4261_v21  ;;  %v415_v21 = vld [vmem:[%s5243_s27 + $0x1e8] sm:$0xff] }
  0xae   : > { %4266 = vmatprep.subr.bf16.mxu0 %v4265_v24 }
  0xb1   : > { %4268 = vmatpush3.bf16.msra.mxu0 %v4265_v24  ;;  %v417_v24 = vld [vmem:[%s5243_s27 + $0x1f8] sm:$0xff] }
  0xb4   : > { %3566 = vmatmul.mubr.f32.vlgmr.msra.gmra.mrb[0].mxu0 %v355_v25  ;;  %v434_v25 = vld [vmem:[#allocation8] sm:$0xff] }
  0xb5   : > { %3568 = vmatprep.mubr.f32.mxu0 %v356_v26  ;;  %v435_v26 = vld [vmem:[#allocation8 + $0x8] sm:$0xff] }
  0xb8   : > { %3569 = vmatmul.mubr.f32.gmra.mrb[2].mxu0 %v357_v27  ;;  %v4397_v27 = vpack.c.bf16 %v435_v26, %v434_v25  ;;  %v5350_v26 = vld [vmem:[%s5235_s20 + $0x38] sm:$0xff] }
  0xb9   : > { %3571 = vmatprep.mubr.f32.mxu0 %v358_v28 }
  0xba   : > { %4398 = vmatprep.subr.bf16.mxu0 %v4397_v27 }
  0xbb   : > { %4400 = vmatpush3.bf16.msra.mxu0 %v4397_v27 }
  0xbc   : > { %3572 = vmatmul.mubr.f32.gmra.mrb[4].mxu0 %v359_v29 }
  0xbd   : > { %3574 = vmatprep.mubr.f32.mxu0 %v360_v30 }
  0xc0   : > { %3575 = vmatmul.mubr.f32.gmra.mrb[6].mxu0 %v361_v31 }
  0xc1   : > { %3577 = vmatprep.mubr.f32.mxu0 %v362_v32 }
  0xc4   : > { %3578 = vmatmul.mubr.f32.gmra.mrb[8].mxu0 %v363_v33 }
  0xc5   : > { %3580 = vmatprep.mubr.f32.mxu0 %v364_v34 }
  0xc8   : > { %3581 = vmatmul.mubr.f32.gmra.mrb[10].mxu0 %v365_v35 }
  0xc9   : > { %3583 = vmatprep.mubr.f32.mxu0 %v366_v36 }
  0xcc   : > { %3584 = vmatmul.mubr.f32.gmra.mrb[12].mxu0 %v367_v37 }
  0xcd   : > { %3586 = vmatprep.mubr.f32.mxu0 %v368_v38  ;;  %v436_v38 = vld [vmem:[#allocation8 + $0x10] sm:$0xff] }
  0xd0   : > { %3587 = vmatmul.mubr.f32.gmra.mrb[14].mxu0 %v369_v39  ;;  %v437_v39 = vld [vmem:[#allocation8 + $0x18] sm:$0xff] }
  0xd1   : > { %3589 = vmatprep.mubr.f32.mxu0 %v370_v40 }
  0xd4   : > { %3590 = vmatmul.mubr.f32.gmra.mrb[16].mxu0 %v371_v41  ;;  %v4401_v41 = vpack.c.bf16 %v437_v39, %v436_v38  ;;  %v5369_v39 = vld [vmem:[%s5235_s20 + $0x60] sm:$0xff] }
  0xd5   : > { %3592 = vmatprep.mubr.f32.mxu0 %v372_v42 }
  0xd6   : > { %4402 = vmatprep.subr.bf16.mxu0 %v4401_v41 }
  0xd7   : > { %4404 = vmatpush3.bf16.msra.mxu0 %v4401_v41 }
  0xd8   : > { %3593 = vmatmul.mubr.f32.gmra.mrb[18].mxu0 %v373_v43 }
  0xd9   : > { %3595 = vmatprep.mubr.f32.mxu0 %v374_v44 }
  0xdc   : > { %3596 = vmatmul.mubr.f32.gmra.mrb[20].mxu0 %v375_v45 }
  0xdd   : > { %3598 = vmatprep.mubr.f32.mxu0 %v376_v46 }
  0xe0   : > { %3599 = vmatmul.mubr.f32.gmra.mrb[22].mxu0 %v377_v47 }
  0xe1   : > { %3601 = vmatprep.mubr.f32.mxu0 %v378_v48 }
  0xe4   : > { %3602 = vmatmul.mubr.f32.gmra.mrb[24].mxu0 %v379_v49 }
  0xe5   : > { %3604 = vmatprep.mubr.f32.mxu0 %v380_v50 }
  0xe8   : > { %3605 = vmatmul.mubr.f32.gmra.mrb[26].mxu0 %v381_v51 }
  0xe9   : > { %3607 = vmatprep.mubr.f32.mxu0 %v382_v52 }
  0xec   : > { %3608 = vmatmul.mubr.f32.gmra.mrb[28].mxu0 %v383_v53  ;;  %v438_v53 = vld [vmem:[#allocation8 + $0x20] sm:$0xff] }
  0xed   : > { %3610 = vmatprep.mubr.f32.mxu0 %v384_v54  ;;  %v439_v54 = vld [vmem:[#allocation8 + $0x28] sm:$0xff] }
  0xf0   : > { %3611 = vmatmul.mubr.f32.gmra.mrb[30].mxu0 %v385_v55 }
  0xf1   : > { %3613 = vmatprep.mubr.f32.mxu0 %v386_v56  ;;  %v4405_v56 = vpack.c.bf16 %v439_v54, %v438_v53  ;;  %v5393_v54 = vld [vmem:[%s5235_s20 + $0x90] sm:$0xff] }
  0xf3   : > { %4406 = vmatprep.subr.bf16.mxu0 %v4405_v56 }
  0xf4   : > { %3614 = vmatmul.mubr.f32.gmra.mrb[32].mxu0 %v387_v57 }
  0xf5   : > { %3616 = vmatprep.mubr.f32.mxu0 %v388_v58  ;;  %4408 = vmatpush3.bf16.msra.mxu0 %v4405_v56 }
  0xf8   : > { %3617 = vmatmul.mubr.f32.gmra.mrb[34].mxu0 %v389_v59  ;;  %v440_v59 = vld [vmem:[#allocation8 + $0x30] sm:$0xff] }
  0xf9   : > { %3619 = vmatprep.mubr.f32.mxu0 %v390_v60  ;;  %v441_v60 = vld [vmem:[#allocation8 + $0x38] sm:$0xff] }
  0xfc   : > { %3620 = vmatmul.mubr.f32.gmra.mrb[36].mxu0 %v391_v61  ;;  %v442_v61 = vld [vmem:[#allocation8 + $0x40] sm:$0xff] }
  0xfd   : > { %3622 = vmatprep.mubr.f32.mxu0 %v392_v62 }
 0x100   : > { %3623 = vmatmul.mubr.f32.gmra.mrb[38].mxu0 %v393_v63  ;;  %v5326_v63 = vld [vmem:[%s5235_s20 + $0x8] sm:$0xff] }
 0x101   : > { %3625 = vmatprep.mubr.f32.mxu0 %v394_v0  ;;  %v4409_v0 = vpack.c.bf16 %v441_v60, %v440_v59  ;;  %v5401_v59 = vld [vmem:[%s5235_s20 + $0xa0] sm:$0xff] }
 0x103   : > { %4410 = vmatprep.subr.bf16.mxu0 %v4409_v0 }
 0x104   : > { %3626 = vmatmul.mubr.f32.gmra.mrb[40].mxu0 %v395_v1  ;;  %v443_v1 = vld [vmem:[#allocation8 + $0x48] sm:$0xff] }
 0x105   : > { %3628 = vmatprep.mubr.f32.mxu0 %v396_v2  ;;  %4412 = vmatpush3.bf16.msra.mxu0 %v4409_v0 }
 0x108   : > { %3629 = vmatmul.mubr.f32.gmra.mrb[42].mxu0 %v397_v3  ;;  %v5329_v3 = vld [vmem:[%s5235_s20 + $0x10] sm:$0xff] }
 0x109   : > { %3631 = vmatprep.mubr.f32.mxu0 %v398_v4  ;;  %v4413_v4 = vpack.c.bf16 %v443_v1, %v442_v61  ;;  %v5409_v1 = vld [vmem:[%s5235_s20 + $0xb0] sm:$0xff] }
 0x10b   : > { %4414 = vmatprep.subr.bf16.mxu0 %v4413_v4 }
 0x10c   : > { %3632 = vmatmul.mubr.f32.gmra.mrb[44].mxu0 %v399_v5 }
 0x10d   : > { %3634 = vmatprep.mubr.f32.mxu0 %v400_v6  ;;  %v444_v6 = vld [vmem:[#allocation8 + $0x50] sm:$0xff]  ;;  %4416 = vmatpush3.bf16.msra.mxu0 %v4413_v4 }
 0x110   : > { %3635 = vmatmul.mubr.f32.gmra.mrb[46].mxu0 %v401_v7  ;;  %v445_v7 = vld [vmem:[#allocation8 + $0x58] sm:$0xff] }
 0x111   : > { %3637 = vmatprep.mubr.f32.mxu0 %v402_v8 }
 0x114   : > { %3638 = vmatmul.mubr.f32.gmra.mrb[48].mxu0 %v403_v9  ;;  %v5334_v9 = vld [vmem:[%s5235_s20 + $0x18] sm:$0xff] }
 0x115   : > { %3640 = vmatprep.mubr.f32.mxu0 %v404_v10 }
 0x118   : > { %3641 = vmatmul.mubr.f32.gmra.mrb[50].mxu0 %v405_v11  ;;  %v5337_v11 = vld [vmem:[%s5235_s20 + $0x20] sm:$0xff] }
 0x119   : > { %3643 = vmatprep.mubr.f32.mxu0 %v406_v12  ;;  %v4417_v12 = vpack.c.bf16 %v445_v7, %v444_v6  ;;  %v5417_v7 = vld [vmem:[%s5235_s20 + $0xc0] sm:$0xff] }
 0x11b   : > { %4418 = vmatprep.subr.bf16.mxu0 %v4417_v12 }
 0x11c   : > { %3644 = vmatmul.mubr.f32.gmra.mrb[52].mxu0 %v407_v13 }
 0x11d   : > { %3646 = vmatprep.mubr.f32.mxu0 %v408_v14  ;;  %v446_v14 = vld [vmem:[#allocation8 + $0x60] sm:$0xff]  ;;  %4420 = vmatpush3.bf16.msra.mxu0 %v4417_v12  ;;  %v5422_v12 = vld [vmem:[%s5235_s20 + $0xc8] sm:$0xff] }
 0x120   : > { %3647 = vmatmul.mubr.f32.gmra.mrb[54].mxu0 %v409_v15  ;;  %v447_v15 = vld [vmem:[#allocation8 + $0x68] sm:$0xff] }
 0x121   : > { %3649 = vmatprep.mubr.f32.mxu0 %v410_v16 }
 0x124   : > { %3650 = vmatmul.mubr.f32.gmra.mrb[56].mxu0 %v411_v17  ;;  %v5342_v17 = vld [vmem:[%s5235_s20 + $0x28] sm:$0xff] }
 0x125   : > { %3652 = vmatprep.mubr.f32.mxu0 %v412_v18 }
 0x128   : > { %3653 = vmatmul.mubr.f32.gmra.mrb[58].mxu0 %v413_v19  ;;  %v5345_v19 = vld [vmem:[%s5235_s20 + $0x30] sm:$0xff] }
 0x129   : > { %3655 = vmatprep.mubr.f32.mxu0 %v414_v20  ;;  %v4421_v20 = vpack.c.bf16 %v447_v15, %v446_v14  ;;  %v5425_v14 = vld [vmem:[%s5235_s20 + $0xd0] sm:$0xff] }
 0x12b   : > { %4422 = vmatprep.subr.bf16.mxu0 %v4421_v20 }
 0x12c   : > { %3656 = vmatmul.mubr.f32.gmra.mrb[60].mxu0 %v415_v21 }
 0x12d   : > { %3658 = vmatprep.mubr.f32.mxu0 %v416_v23  ;;  %v448_v23 = vld [vmem:[#allocation8 + $0x70] sm:$0xff]  ;;  %4424 = vmatpush3.bf16.msra.mxu0 %v4421_v20 }
 0x130   : > { %3659 = vmatmul.mubr.f32.gmra.mrb[62].mxu0 %v417_v24  ;;  %v449_v24 = vld [vmem:[#allocation8 + $0x78] sm:$0xff] }
 0x187   : > { %v3567_v28 = vpop.f32.mrb[0].mxu0 }
 0x188   : > { %v516_v29 = vpop.f32.mrb[1].mxu0 }
 0x189   : > { %v4269_v30 = vpack.c.bf16 %v3567_v28, %v516_v29  ;;  %v5353_v28 = vld [vmem:[%s5235_s20 + $0x40] sm:$0xff]  ;;  %v4425_v29 = vpack.c.bf16 %v449_v24, %v448_v23 }
 0x18b   : > { %v3570_v31 = vpop.f32.mrb[2].mxu0  ;;  %4270 = vmatprep.subr.bf16.mxu1 %v4269_v30  ;;  %4426 = vmatprep.subr.bf16.mxu0 %v4425_v29 }
 0x18c   : > { %v526_v32 = vpop.f32.mrb[3].mxu0  ;;  %4272 = vmatpush3.bf16.msra.mxu1 %v4269_v30  ;;  %4428 = vmatpush3.bf16.msra.mxu0 %v4425_v29  ;;  %v5441_v29 = vld [vmem:[%s5235_s20 + $0xf0] sm:$0xff] }
 0x18d   : > { %v4273_v33 = vpack.c.bf16 %v3570_v31, %v526_v32  ;;  %v5358_v32 = vld [vmem:[%s5235_s20 + $0x48] sm:$0xff] }
 0x18f   : > { %v3573_v34 = vpop.f32.mrb[4].mxu0  ;;  %4274 = vmatprep.subr.bf16.mxu1 %v4273_v33 }
 0x190   : > { %v536_v35 = vpop.f32.mrb[5].mxu0  ;;  %4276 = vmatpush3.bf16.msra.mxu1 %v4273_v33 }
 0x191   : > { %v4277_v36 = vpack.c.bf16 %v3573_v34, %v536_v35  ;;  %v5361_v34 = vld [vmem:[%s5235_s20 + $0x50] sm:$0xff] }
 0x193   : > { %v3576_v37 = vpop.f32.mrb[6].mxu0  ;;  %4278 = vmatprep.subr.bf16.mxu1 %v4277_v36 }
 0x194   : > { %v546_v40 = vpop.f32.mrb[7].mxu0  ;;  %4280 = vmatpush3.bf16.msra.mxu1 %v4277_v36 }
 0x195   : > { %v4281_v42 = vpack.c.bf16 %v3576_v37, %v546_v40  ;;  %v5366_v37 = vld [vmem:[%s5235_s20 + $0x58] sm:$0xff] }
 0x197   : > { %v3579_v43 = vpop.f32.mrb[8].mxu0  ;;  %4282 = vmatprep.subr.bf16.mxu1 %v4281_v42 }
 0x198   : > { %v556_v44 = vpop.f32.mrb[9].mxu0  ;;  %4284 = vmatpush3.bf16.msra.mxu1 %v4281_v42  ;;  %v5374_v42 = vld [vmem:[%s5235_s20 + $0x68] sm:$0xff] }
 0x199   : > { %v4285_v45 = vpack.c.bf16 %v3579_v43, %v556_v44  ;;  %v5377_v44 = vld [vmem:[%s5235_s20 + $0x70] sm:$0xff] }
 0x19b   : > { %v3582_v46 = vpop.f32.mrb[10].mxu0  ;;  %4286 = vmatprep.subr.bf16.mxu1 %v4285_v45 }
 0x19c   : > { %v566_v47 = vpop.f32.mrb[11].mxu0  ;;  %4288 = vmatpush3.bf16.msra.mxu1 %v4285_v45 }
 0x19d   : > { %v4289_v48 = vpack.c.bf16 %v3582_v46, %v566_v47  ;;  %v5382_v47 = vld [vmem:[%s5235_s20 + $0x78] sm:$0xff] }
 0x19f   : > { %v3585_v49 = vpop.f32.mrb[12].mxu0  ;;  %4290 = vmatprep.subr.bf16.mxu1 %v4289_v48 }
 0x1a0   : > { %v576_v50 = vpop.f32.mrb[13].mxu0  ;;  %4292 = vmatpush3.bf16.msra.mxu1 %v4289_v48 }
 0x1a1   : > { %v4293_v51 = vpack.c.bf16 %v3585_v49, %v576_v50  ;;  %v5385_v49 = vld [vmem:[%s5235_s20 + $0x80] sm:$0xff] }
 0x1a3   : > { %v3588_v52 = vpop.f32.mrb[14].mxu0  ;;  %4294 = vmatprep.subr.bf16.mxu1 %v4293_v51 }
 0x1a4   : > { %v586_v55 = vpop.f32.mrb[15].mxu0  ;;  %4296 = vmatpush3.bf16.msra.mxu1 %v4293_v51 }
 0x1a5   : > { %v4297_v57 = vpack.c.bf16 %v3588_v52, %v586_v55  ;;  %v5390_v52 = vld [vmem:[%s5235_s20 + $0x88] sm:$0xff] }
 0x1a7   : > { %v3591_v58 = vpop.f32.mrb[16].mxu0  ;;  %4298 = vmatprep.subr.bf16.mxu1 %v4297_v57 }
 0x1a8   : > { %v596_v62 = vpop.f32.mrb[17].mxu0  ;;  %4300 = vmatpush3.bf16.msra.mxu1 %v4297_v57  ;;  %v5398_v57 = vld [vmem:[%s5235_s20 + $0x98] sm:$0xff] }
 0x1a9   : > { %v4301_v2 = vpack.c.bf16 %v3591_v58, %v596_v62  ;;  %v5406_v62 = vld [vmem:[%s5235_s20 + $0xa8] sm:$0xff] }
 0x1ab   : > { %v3594_v5 = vpop.f32.mrb[18].mxu0  ;;  %3694 = vmatmul.mubr.f32.vlgmr.msra.gmra.mrb[0].mxu1 %v5326_v63  ;;  %4302 = vmatprep.subr.bf16.mxu1 %v4301_v2 }
 0x1ac   : > { %v606_v8 = vpop.f32.mrb[19].mxu0  ;;  %4304 = vmatpush3.bf16.msra.mxu1 %v4301_v2  ;;  %3696 = vmatprep.mubr.f32.mxu1 %v5329_v3 }
 0x1ad   : > { %v4305_v10 = vpack.c.bf16 %v3594_v5, %v606_v8  ;;  %v5414_v5 = vld [vmem:[%s5235_s20 + $0xb8] sm:$0xff] }
 0x1af   : > { %v3597_v13 = vpop.f32.mrb[20].mxu0  ;;  %3697 = vmatmul.mubr.f32.gmra.mrb[2].mxu1 %v5334_v9  ;;  %4306 = vmatprep.subr.bf16.mxu1 %v4305_v10 }
 0x1b0   : > { %v616_v16 = vpop.f32.mrb[21].mxu0  ;;  %4308 = vmatpush3.bf16.msra.mxu1 %v4305_v10  ;;  %3699 = vmatprep.mubr.f32.mxu1 %v5337_v11 }
 0x1b1   : > { %v4309_v18 = vpack.c.bf16 %v3597_v13, %v616_v16 }
 0x1b3   : > { %v3600_v21 = vpop.f32.mrb[22].mxu0  ;;  %3700 = vmatmul.mubr.f32.gmra.mrb[4].mxu1 %v5342_v17  ;;  %4310 = vmatprep.subr.bf16.mxu1 %v4309_v18 }
 0x1b4   : > { %v626_v25 = vpop.f32.mrb[23].mxu0  ;;  %4312 = vmatpush3.bf16.msra.mxu1 %v4309_v18  ;;  %3702 = vmatprep.mubr.f32.mxu1 %v5345_v19  ;;  %v5430_v18 = vld [vmem:[%s5235_s20 + $0xd8] sm:$0xff] }
 0x1b5   : > { %v4313_v27 = vpack.c.bf16 %v3600_v21, %v626_v25  ;;  %v5433_v21 = vld [vmem:[%s5235_s20 + $0xe0] sm:$0xff]  ;;  %v5438_v25 = vld [vmem:[%s5235_s20 + $0xe8] sm:$0xff] }
 0x1b7   : > { %v3603_v30 = vpop.f32.mrb[24].mxu0  ;;  %3703 = vmatmul.mubr.f32.gmra.mrb[6].mxu1 %v5350_v26  ;;  %4314 = vmatprep.subr.bf16.mxu1 %v4313_v27 }
 0x1b8   : > { %v636_v31 = vpop.f32.mrb[25].mxu0  ;;  %4316 = vmatpush3.bf16.msra.mxu1 %v4313_v27  ;;  %3705 = vmatprep.mubr.f32.mxu1 %v5353_v28 }
 0x1b9   : > { %v4317_v33 = vpack.c.bf16 %v3603_v30, %v636_v31 }
 0x1bb   : > { %v3606_v35 = vpop.f32.mrb[26].mxu0  ;;  %3706 = vmatmul.mubr.f32.gmra.mrb[8].mxu1 %v5358_v32  ;;  %4318 = vmatprep.subr.bf16.mxu1 %v4317_v33 }
 0x1bc   : > { %v646_v36 = vpop.f32.mrb[27].mxu0  ;;  %4320 = vmatpush3.bf16.msra.mxu1 %v4317_v33  ;;  %3708 = vmatprep.mubr.f32.mxu1 %v5361_v34  ;;  %v5446_v33 = vld [vmem:[%s5235_s20 + $0xf8] sm:$0xff] }
 0x1bd   : > { %v4321_v38 = vpack.c.bf16 %v3606_v35, %v646_v36  ;;  %v5449_v36 = vld [vmem:[%s5235_s20 + $0x100] sm:$0xff] }
 0x1bf   : > { %v3609_v40 = vpop.f32.mrb[28].mxu0  ;;  %3709 = vmatmul.mubr.f32.gmra.mrb[10].mxu1 %v5366_v37  ;;  %4322 = vmatprep.subr.bf16.mxu1 %v4321_v38 }
 0x1c0   : > { %v656_v41 = vpop.f32.mrb[29].mxu0  ;;  %4324 = vmatpush3.bf16.msra.mxu1 %v4321_v38  ;;  %3711 = vmatprep.mubr.f32.mxu1 %v5369_v39 }
 0x1c1   : > { %v4325_v43 = vpack.c.bf16 %v3609_v40, %v656_v41  ;;  %v5454_v41 = vld [vmem:[%s5235_s20 + $0x108] sm:$0xff] }
 0x1c3   : > { %v3612_v45 = vpop.f32.mrb[30].mxu0  ;;  %3712 = vmatmul.mubr.f32.gmra.mrb[12].mxu1 %v5374_v42  ;;  %4326 = vmatprep.subr.bf16.mxu1 %v4325_v43 }
 0x1c4   : > { %v666_v46 = vpop.f32.mrb[31].mxu0  ;;  %4328 = vmatpush3.bf16.msra.mxu1 %v4325_v43  ;;  %3714 = vmatprep.mubr.f32.mxu1 %v5377_v44 }
 0x1c5   : > { %v4329_v48 = vpack.c.bf16 %v3612_v45, %v666_v46  ;;  %v5457_v45 = vld [vmem:[%s5235_s20 + $0x110] sm:$0xff] }
 0x1c7   : > { %v3615_v50 = vpop.f32.mrb[32].mxu0  ;;  %3715 = vmatmul.mubr.f32.gmra.mrb[14].mxu1 %v5382_v47  ;;  %4330 = vmatprep.subr.bf16.mxu1 %v4329_v48 }
 0x1c8   : > { %v676_v51 = vpop.f32.mrb[33].mxu0  ;;  %4332 = vmatpush3.bf16.msra.mxu1 %v4329_v48  ;;  %3749 = vmatprep.mubr.f32.mxu1 %v5385_v49 }
 0x1c9   : > { %v4333_v53 = vpack.c.bf16 %v3615_v50, %v676_v51  ;;  %v5462_v50 = vld [vmem:[%s5235_s20 + $0x118] sm:$0xff] }
 0x1cb   : > { %v3618_v55 = vpop.f32.mrb[34].mxu0  ;;  %3750 = vmatmul.mubr.f32.vlgmr.msra.gmra.mrb[16].mxu1 %v5390_v52  ;;  %4334 = vmatprep.subr.bf16.mxu1 %v4333_v53 }
 0x1cc   : > { %v686_v56 = vpop.f32.mrb[35].mxu0  ;;  %4336 = vmatpush3.bf16.msra.mxu1 %v4333_v53  ;;  %3752 = vmatprep.mubr.f32.mxu1 %v5393_v54  ;;  %v5465_v53 = vld [vmem:[%s5235_s20 + $0x120] sm:$0xff] }
 0x1cd   : > { %v4337_v58 = vpack.c.bf16 %v3618_v55, %v686_v56 }
 0x1cf   : > { %v3621_v60 = vpop.f32.mrb[36].mxu0  ;;  %3753 = vmatmul.mubr.f32.gmra.mrb[18].mxu1 %v5398_v57  ;;  %4338 = vmatprep.subr.bf16.mxu1 %v4337_v58 }
 0x1d0   : > { %v696_v61 = vpop.f32.mrb[37].mxu0  ;;  %4340 = vmatpush3.bf16.msra.mxu1 %v4337_v58  ;;  %3755 = vmatprep.mubr.f32.mxu1 %v5401_v59  ;;  %v5470_v58 = vld [vmem:[%s5235_s20 + $0x128] sm:$0xff] }
 0x1d1   : > { %v4341_v0 = vpack.c.bf16 %v3621_v60, %v696_v61  ;;  %v5473_v61 = vld [vmem:[%s5235_s20 + $0x130] sm:$0xff] }
 0x1d3   : > { %v3624_v2 = vpop.f32.mrb[38].mxu0  ;;  %3756 = vmatmul.mubr.f32.gmra.mrb[20].mxu1 %v5406_v62  ;;  %4342 = vmatprep.subr.bf16.mxu1 %v4341_v0 }
 0x1d4   : > { %v706_v4 = vpop.f32.mrb[39].mxu0  ;;  %4344 = vmatpush3.bf16.msra.mxu1 %v4341_v0  ;;  %3758 = vmatprep.mubr.f32.mxu1 %v5409_v1 }
 0x1d5   : > { %v4345_v6 = vpack.c.bf16 %v3624_v2, %v706_v4  ;;  %v5478_v4 = vld [vmem:[%s5235_s20 + $0x138] sm:$0xff] }
 0x1d7   : > { %v3627_v8 = vpop.f32.mrb[40].mxu0  ;;  %3759 = vmatmul.mubr.f32.gmra.mrb[22].mxu1 %v5414_v5  ;;  %4346 = vmatprep.subr.bf16.mxu1 %v4345_v6 }
 0x1d8   : > { %v716_v10 = vpop.f32.mrb[41].mxu0  ;;  %4348 = vmatpush3.bf16.msra.mxu1 %v4345_v6  ;;  %3761 = vmatprep.mubr.f32.mxu1 %v5417_v7 }
 0x1d9   : > { %v4349_v13 = vpack.c.bf16 %v3627_v8, %v716_v10  ;;  %v5481_v8 = vld [vmem:[%s5235_s20 + $0x140] sm:$0xff] }
 0x1db   : > { %v3630_v15 = vpop.f32.mrb[42].mxu0  ;;  %3762 = vmatmul.mubr.f32.gmra.mrb[24].mxu1 %v5422_v12  ;;  %4350 = vmatprep.subr.bf16.mxu1 %v4349_v13 }
 0x1dc   : > { %v726_v16 = vpop.f32.mrb[43].mxu0  ;;  %4352 = vmatpush3.bf16.msra.mxu1 %v4349_v13  ;;  %3764 = vmatprep.mubr.f32.mxu1 %v5425_v14 }
 0x1dd   : > { %v4353_v20 = vpack.c.bf16 %v3630_v15, %v726_v16  ;;  %v5486_v15 = vld [vmem:[%s5235_s20 + $0x148] sm:$0xff] }
 0x1df   : > { %v3633_v23 = vpop.f32.mrb[44].mxu0  ;;  %3765 = vmatmul.mubr.f32.gmra.mrb[26].mxu1 %v5430_v18  ;;  %4354 = vmatprep.subr.bf16.mxu1 %v4353_v20 }
 0x1e0   : > { %v736_v24 = vpop.f32.mrb[45].mxu0  ;;  %4356 = vmatpush3.bf16.msra.mxu1 %v4353_v20  ;;  %3767 = vmatprep.mubr.f32.mxu1 %v5433_v21  ;;  %v5489_v20 = vld [vmem:[%s5235_s20 + $0x150] sm:$0xff] }
 0x1e1   : > { %v4357_v27 = vpack.c.bf16 %v3633_v23, %v736_v24 }
 0x1e3   : > { %v3636_v30 = vpop.f32.mrb[46].mxu0  ;;  %3768 = vmatmul.mubr.f32.gmra.mrb[28].mxu1 %v5438_v25  ;;  %4358 = vmatprep.subr.bf16.mxu1 %v4357_v27 }
 0x1e4   : > { %v746_v31 = vpop.f32.mrb[47].mxu0  ;;  %4360 = vmatpush3.bf16.msra.mxu1 %v4357_v27  ;;  %3770 = vmatprep.mubr.f32.mxu1 %v5441_v29  ;;  %v5494_v27 = vld [vmem:[%s5235_s20 + $0x158] sm:$0xff] }
 0x1e5   : > { %v4361_v35 = vpack.c.bf16 %v3636_v30, %v746_v31  ;;  %v5497_v31 = vld [vmem:[%s5235_s20 + $0x160] sm:$0xff] }
 0x1e7   : > { %v3639_v38 = vpop.f32.mrb[48].mxu0  ;;  %3771 = vmatmul.mubr.f32.gmra.mrb[30].mxu1 %v5446_v33  ;;  %4362 = vmatprep.subr.bf16.mxu1 %v4361_v35 }
 0x1e8   : > { %v756_v40 = vpop.f32.mrb[49].mxu0  ;;  %4364 = vmatpush3.bf16.msra.mxu1 %v4361_v35  ;;  %3805 = vmatprep.mubr.f32.mxu1 %v5449_v36 }
 0x1e9   : > { %v4365_v43 = vpack.c.bf16 %v3639_v38, %v756_v40  ;;  %v5502_v40 = vld [vmem:[%s5235_s20 + $0x168] sm:$0xff] }
 0x1eb   : > { %v3642_v46 = vpop.f32.mrb[50].mxu0  ;;  %3806 = vmatmul.mubr.f32.vlgmr.msra.gmra.mrb[32].mxu1 %v5454_v41  ;;  %4366 = vmatprep.subr.bf16.mxu1 %v4365_v43 }
 0x1ec   : > { %v766_v48 = vpop.f32.mrb[51].mxu0  ;;  %4368 = vmatpush3.bf16.msra.mxu1 %v4365_v43  ;;  %3808 = vmatprep.mubr.f32.mxu1 %v5457_v45 }
 0x1ed   : > { %v4369_v51 = vpack.c.bf16 %v3642_v46, %v766_v48  ;;  %v5505_v46 = vld [vmem:[%s5235_s20 + $0x170] sm:$0xff] }
 0x1ef   : > { %v3645_v55 = vpop.f32.mrb[52].mxu0  ;;  %3809 = vmatmul.mubr.f32.gmra.mrb[34].mxu1 %v5462_v50  ;;  %4370 = vmatprep.subr.bf16.mxu1 %v4369_v51 }
 0x1f0   : > { %v776_v56 = vpop.f32.mrb[53].mxu0  ;;  %4372 = vmatpush3.bf16.msra.mxu1 %v4369_v51  ;;  %3811 = vmatprep.mubr.f32.mxu1 %v5465_v53 }
 0x1f1   : > { %v4373_v60 = vpack.c.bf16 %v3645_v55, %v776_v56  ;;  %v5510_v55 = vld [vmem:[%s5235_s20 + $0x178] sm:$0xff] }
 0x1f3   : > { %v3648_v0 = vpop.f32.mrb[54].mxu0  ;;  %3812 = vmatmul.mubr.f32.gmra.mrb[36].mxu1 %v5470_v58  ;;  %4374 = vmatprep.subr.bf16.mxu1 %v4373_v60 }
 0x1f4   : > { %v786_v2 = vpop.f32.mrb[55].mxu0  ;;  %4376 = vmatpush3.bf16.msra.mxu1 %v4373_v60  ;;  %3814 = vmatprep.mubr.f32.mxu1 %v5473_v61  ;;  %v5513_v60 = vld [vmem:[%s5235_s20 + $0x180] sm:$0xff] }
 0x1f5   : > { %v4377_v6 = vpack.c.bf16 %v3648_v0, %v786_v2  ;;  %v5518_v0 = vld [vmem:[%s5235_s20 + $0x188] sm:$0xff]  ;;  %v5521_v2 = vld [vmem:[%s5235_s20 + $0x190] sm:$0xff] }
 0x1f6   : > { %6460 = vst [vmem:[#allocation16_spill] sm:$0xff] %v5518_v0  ;;  %6461 = vst [vmem:[#allocation17_spill] sm:$0xff] %v5521_v2 }
 0x1f7   : > { %v3651_v10 = vpop.f32.mrb[56].mxu0  ;;  %3815 = vmatmul.mubr.f32.gmra.mrb[38].mxu1 %v5478_v4  ;;  %4378 = vmatprep.subr.bf16.mxu1 %v4377_v6 }
 0x1f8   : > { %v796_v13 = vpop.f32.mrb[57].mxu0  ;;  %4380 = vmatpush3.bf16.msra.mxu1 %v4377_v6  ;;  %3817 = vmatprep.mubr.f32.mxu1 %v5481_v8  ;;  %v5526_v6 = vld [vmem:[%s5235_s20 + $0x198] sm:$0xff] }
 0x1f9   : > { %v4381_v16 = vpack.c.bf16 %v3651_v10, %v796_v13  ;;  %6462 = vst [vmem:[#allocation18_spill] sm:$0xff] %v5526_v6  ;;  %v5529_v10 = vld [vmem:[%s5235_s20 + $0x1a0] sm:$0xff]  ;;  %v5534_v13 = vld [vmem:[%s5235_s20 + $0x1a8] sm:$0xff] }
 0x1fa   : > { %6463 = vst [vmem:[#allocation19_spill] sm:$0xff] %v5529_v10  ;;  %6464 = vst [vmem:[#allocation20_spill] sm:$0xff] %v5534_v13 }
 0x1fb   : > { %v3654_v23 = vpop.f32.mrb[58].mxu0  ;;  %3818 = vmatmul.mubr.f32.gmra.mrb[40].mxu1 %v5486_v15  ;;  %4382 = vmatprep.subr.bf16.mxu1 %v4381_v16 }
 0x1fc   : > { %v806_v24 = vpop.f32.mrb[59].mxu0  ;;  %4384 = vmatpush3.bf16.msra.mxu1 %v4381_v16  ;;  %3820 = vmatprep.mubr.f32.mxu1 %v5489_v20  ;;  %v5537_v16 = vld [vmem:[%s5235_s20 + $0x1b0] sm:$0xff] }
 0x1fd   : > { %v4385_v30 = vpack.c.bf16 %v3654_v23, %v806_v24  ;;  %6465 = vst [vmem:[#allocation21_spill] sm:$0xff] %v5537_v16  ;;  %v5542_v23 = vld [vmem:[%s5235_s20 + $0x1b8] sm:$0xff]  ;;  %v5545_v24 = vld [vmem:[%s5235_s20 + $0x1c0] sm:$0xff] }
 0x1fe   : > { %6466 = vst [vmem:[#allocation22_spill] sm:$0xff] %v5542_v23  ;;  %6467 = vst [vmem:[#allocation23_spill] sm:$0xff] %v5545_v24 }
 0x1ff   : > { %v3657_v35 = vpop.f32.mrb[60].mxu0  ;;  %3821 = vmatmul.mubr.f32.gmra.mrb[42].mxu1 %v5494_v27  ;;  %4386 = vmatprep.subr.bf16.mxu1 %v4385_v30 }
 0x200   : > { %v816_v38 = vpop.f32.mrb[61].mxu0  ;;  %4388 = vmatpush3.bf16.msra.mxu1 %v4385_v30  ;;  %3823 = vmatprep.mubr.f32.mxu1 %v5497_v31  ;;  %v5550_v30 = vld [vmem:[%s5235_s20 + $0x1c8] sm:$0xff] }
 0x201   : > { %v4389_v43 = vpack.c.bf16 %v3657_v35, %v816_v38  ;;  %6468 = vst [vmem:[#allocation24_spill] sm:$0xff] %v5550_v30  ;;  %v5553_v35 = vld [vmem:[%s5235_s20 + $0x1d0] sm:$0xff]  ;;  %v5558_v38 = vld [vmem:[%s5235_s20 + $0x1d8] sm:$0xff] }
 0x202   : > { %6469 = vst [vmem:[#allocation25_spill] sm:$0xff] %v5553_v35  ;;  %6470 = vst [vmem:[#allocation26_spill] sm:$0xff] %v5558_v38 }
 0x203   : > { %v3660_v48 = vpop.f32.mrb[62].mxu0  ;;  %3824 = vmatmul.mubr.f32.gmra.mrb[44].mxu1 %v5502_v40  ;;  %4390 = vmatprep.subr.bf16.mxu1 %v4389_v43 }
 0x204   : > { %v826_v51 = vpop.f32.mrb[63].mxu0  ;;  %4392 = vmatpush3.bf16.msra.mxu1 %v4389_v43  ;;  %3826 = vmatprep.mubr.f32.mxu1 %v5505_v46  ;;  %v5561_v43 = vld [vmem:[%s5235_s20 + $0x1e0] sm:$0xff] }
 0x205   : > { %v4393_v56 = vpack.c.bf16 %v3660_v48, %v826_v51  ;;  %6471 = vst [vmem:[#allocation27_spill] sm:$0xff] %v5561_v43  ;;  %v5566_v48 = vld [vmem:[%s5235_s20 + $0x1e8] sm:$0xff]  ;;  %v5569_v51 = vld [vmem:[%s5235_s20 + $0x1f0] sm:$0xff] }
 0x206   : > { %6472 = vst [vmem:[#allocation28_spill] sm:$0xff] %v5566_v48  ;;  %6473 = vst [vmem:[#allocation29_spill] sm:$0xff] %v5569_v51 }
 0x207   : > { %3827 = vmatmul.mubr.f32.gmra.mrb[46].mxu1 %v5510_v55  ;;  %4394 = vmatprep.subr.bf16.mxu1 %v4393_v56 }
 0x208   : > { %4396 = vmatpush3.bf16.msra.mxu1 %v4393_v56  ;;  %3861 = vmatprep.mubr.f32.mxu1 %v5513_v60  ;;  %v5574_v56 = vld [vmem:[%s5235_s20 + $0x1f8] sm:$0xff] }
 0x209   : > { %6474 = vst [vmem:[#allocation30_spill] sm:$0xff] %v5574_v56 }
 0x20b   : > { %3862 = vmatmul.mubr.f32.vlgmr.msra.gmra.mrb[48].mxu1 %v5518_v0 }
 0x20c   : > { %3864 = vmatprep.mubr.f32.mxu1 %v5521_v2 }
 0x20f   : > { %3865 = vmatmul.mubr.f32.gmra.mrb[50].mxu1 %v5526_v6 }
 0x210   : > { %3867 = vmatprep.mubr.f32.mxu1 %v5529_v10 }
 0x213   : > { %3868 = vmatmul.mubr.f32.gmra.mrb[52].mxu1 %v5534_v13 }
 0x214   : > { %3870 = vmatprep.mubr.f32.mxu1 %v5537_v16 }
 0x217   : > { %3871 = vmatmul.mubr.f32.gmra.mrb[54].mxu1 %v5542_v23 }
 0x218   : > { %3873 = vmatprep.mubr.f32.mxu1 %v5545_v24 }
 0x21b   : > { %3874 = vmatmul.mubr.f32.gmra.mrb[56].mxu1 %v5550_v30 }
 0x21c   : > { %3876 = vmatprep.mubr.f32.mxu1 %v5553_v35 }
 0x21f   : > { %3877 = vmatmul.mubr.f32.gmra.mrb[58].mxu1 %v5558_v38 }
 0x220   : > { %3879 = vmatprep.mubr.f32.mxu1 %v5561_v43 }
 0x223   : > { %3880 = vmatmul.mubr.f32.gmra.mrb[60].mxu1 %v5566_v48 }
 0x224   : > { %3882 = vmatprep.mubr.f32.mxu1 %v5569_v51 }
 0x227   : > { %3883 = vmatmul.mubr.f32.gmra.mrb[62].mxu1 %v5574_v56 }
 0x228   : > { %4045 = vmatprep.mubr.f32.mxu1 %v5320_v22 }
 0x27e   : > { %v3695_v35 = vpop.f32.mrb[0].mxu1 }
 0x27f   : > { %v901_v30 = vpop.f32.mrb[1].mxu1  ;;  %v1416_v38 = vmax.f32 %v3695_v35, 0.0 }
 0x280   : > { %v1415_v24 = vmax.f32 %v901_v30, 0.0 }
 0x282   : > { %v3698_v23 = vpop.f32.mrb[2].mxu1  ;;  %3917 = vmatprep.mubr.f32.mxu0 %v1415_v24 }
 0x283   : > { %v911_v43 = vpop.f32.mrb[3].mxu1  ;;  %3918 = vmatmul.mubr.f32.vlgmr.msra.gmra.mrb[64].mxu0 %v1416_v38  ;;  %v1418_v13 = vmax.f32 %v3698_v23, 0.0 }
 0x284   : > { %v1417_v16 = vmax.f32 %v911_v43, 0.0 }
 0x286   : > { %v3701_v10 = vpop.f32.mrb[4].mxu1  ;;  %3920 = vmatprep.mubr.f32.mxu0 %v1417_v16 }
 0x287   : > { %v921_v48 = vpop.f32.mrb[5].mxu1  ;;  %3921 = vmatmul.mubr.f32.gmra.mrb[66].mxu0 %v1418_v13  ;;  %v1420_v6 = vmax.f32 %v3701_v10, 0.0 }
 0x288   : > { %v1419_v51 = vmax.f32 %v921_v48, 0.0 }
 0x28a   : > { %v3704_v2 = vpop.f32.mrb[6].mxu1  ;;  %3923 = vmatprep.mubr.f32.mxu0 %v1419_v51 }
 0x28b   : > { %v931_v56 = vpop.f32.mrb[7].mxu1  ;;  %3924 = vmatmul.mubr.f32.gmra.mrb[68].mxu0 %v1420_v6  ;;  %v1422_v0 = vmax.f32 %v3704_v2, 0.0 }
 0x28c   : > { %v1421_v22 = vmax.f32 %v931_v56, 0.0 }
 0x28e   : > { %v3707_v30 = vpop.f32.mrb[8].mxu1  ;;  %3926 = vmatprep.mubr.f32.mxu0 %v1421_v22 }
 0x28f   : > { %v941_v35 = vpop.f32.mrb[9].mxu1  ;;  %3927 = vmatmul.mubr.f32.gmra.mrb[70].mxu0 %v1422_v0  ;;  %v1424_v38 = vmax.f32 %v3707_v30, 0.0 }
 0x290   : > { %v1423_v24 = vmax.f32 %v941_v35, 0.0 }
 0x292   : > { %v3710_v43 = vpop.f32.mrb[10].mxu1  ;;  %3929 = vmatprep.mubr.f32.mxu0 %v1423_v24 }
 0x293   : > { %v951_v23 = vpop.f32.mrb[11].mxu1  ;;  %3930 = vmatmul.mubr.f32.gmra.mrb[72].mxu0 %v1424_v38  ;;  %v1426_v13 = vmax.f32 %v3710_v43, 0.0 }
 0x294   : > { %v1425_v16 = vmax.f32 %v951_v23, 0.0 }
 0x296   : > { %v3713_v48 = vpop.f32.mrb[12].mxu1  ;;  %3932 = vmatprep.mubr.f32.mxu0 %v1425_v16 }
 0x297   : > { %v961_v10 = vpop.f32.mrb[13].mxu1  ;;  %3933 = vmatmul.mubr.f32.gmra.mrb[74].mxu0 %v1426_v13  ;;  %v1428_v6 = vmax.f32 %v3713_v48, 0.0 }
 0x298   : > { %v1427_v51 = vmax.f32 %v961_v10, 0.0 }
 0x29a   : > { %v3716_v56 = vpop.f32.mrb[14].mxu1  ;;  %3935 = vmatprep.mubr.f32.mxu0 %v1427_v51 }
 0x29b   : > { %v971_v2 = vpop.f32.mrb[15].mxu1  ;;  %3936 = vmatmul.mubr.f32.gmra.mrb[76].mxu0 %v1428_v6  ;;  %v1430_v0 = vmax.f32 %v3716_v56, 0.0 }
 0x29c   : > { %v1429_v22 = vmax.f32 %v971_v2, 0.0 }
 0x29e   : > { %v3751_v35 = vpop.f32.mrb[16].mxu1  ;;  %3938 = vmatprep.mubr.f32.mxu0 %v1429_v22 }
 0x29f   : > { %v1046_v30 = vpop.f32.mrb[17].mxu1  ;;  %3939 = vmatmul.mubr.f32.gmra.mrb[78].mxu0 %v1430_v0  ;;  %v1432_v38 = vmax.f32 %v3751_v35, 0.0 }
 0x2a0   : > { %v1431_v24 = vmax.f32 %v1046_v30, 0.0 }
 0x2a2   : > { %v3754_v23 = vpop.f32.mrb[18].mxu1  ;;  %3941 = vmatprep.mubr.f32.mxu0 %v1431_v24 }
 0x2a3   : > { %v1056_v43 = vpop.f32.mrb[19].mxu1  ;;  %3942 = vmatmul.mubr.f32.gmra.mrb[80].mxu0 %v1432_v38  ;;  %v1434_v13 = vmax.f32 %v3754_v23, 0.0 }
 0x2a4   : > { %v1433_v16 = vmax.f32 %v1056_v43, 0.0 }
 0x2a6   : > { %v3757_v10 = vpop.f32.mrb[20].mxu1  ;;  %3944 = vmatprep.mubr.f32.mxu0 %v1433_v16 }
 0x2a7   : > { %v1066_v48 = vpop.f32.mrb[21].mxu1  ;;  %3945 = vmatmul.mubr.f32.gmra.mrb[82].mxu0 %v1434_v13  ;;  %v1436_v6 = vmax.f32 %v3757_v10, 0.0 }
 0x2a8   : > { %v1435_v51 = vmax.f32 %v1066_v48, 0.0 }
 0x2aa   : > { %v3760_v2 = vpop.f32.mrb[22].mxu1  ;;  %3947 = vmatprep.mubr.f32.mxu0 %v1435_v51 }
 0x2ab   : > { %v1076_v56 = vpop.f32.mrb[23].mxu1  ;;  %3948 = vmatmul.mubr.f32.gmra.mrb[84].mxu0 %v1436_v6  ;;  %v1438_v0 = vmax.f32 %v3760_v2, 0.0 }
 0x2ac   : > { %v1437_v22 = vmax.f32 %v1076_v56, 0.0 }
 0x2ae   : > { %v3763_v30 = vpop.f32.mrb[24].mxu1  ;;  %3950 = vmatprep.mubr.f32.mxu0 %v1437_v22 }
 0x2af   : > { %v1086_v35 = vpop.f32.mrb[25].mxu1  ;;  %3951 = vmatmul.mubr.f32.gmra.mrb[86].mxu0 %v1438_v0  ;;  %v1440_v38 = vmax.f32 %v3763_v30, 0.0 }
 0x2b0   : > { %v1439_v24 = vmax.f32 %v1086_v35, 0.0 }
 0x2b2   : > { %v3766_v43 = vpop.f32.mrb[26].mxu1  ;;  %3953 = vmatprep.mubr.f32.mxu0 %v1439_v24 }
 0x2b3   : > { %v1096_v23 = vpop.f32.mrb[27].mxu1  ;;  %3954 = vmatmul.mubr.f32.gmra.mrb[88].mxu0 %v1440_v38  ;;  %v1442_v13 = vmax.f32 %v3766_v43, 0.0 }
 0x2b4   : > { %v1441_v16 = vmax.f32 %v1096_v23, 0.0 }
 0x2b6   : > { %v3769_v48 = vpop.f32.mrb[28].mxu1  ;;  %3956 = vmatprep.mubr.f32.mxu0 %v1441_v16 }
 0x2b7   : > { %v1106_v10 = vpop.f32.mrb[29].mxu1  ;;  %3957 = vmatmul.mubr.f32.gmra.mrb[90].mxu0 %v1442_v13  ;;  %v1444_v6 = vmax.f32 %v3769_v48, 0.0 }
 0x2b8   : > { %v1443_v51 = vmax.f32 %v1106_v10, 0.0 }
 0x2ba   : > { %v3772_v56 = vpop.f32.mrb[30].mxu1  ;;  %3959 = vmatprep.mubr.f32.mxu0 %v1443_v51 }
 0x2bb   : > { %v1116_v2 = vpop.f32.mrb[31].mxu1  ;;  %3960 = vmatmul.mubr.f32.gmra.mrb[92].mxu0 %v1444_v6  ;;  %v1446_v0 = vmax.f32 %v3772_v56, 0.0 }
 0x2bc   : > { %v1445_v22 = vmax.f32 %v1116_v2, 0.0 }
 0x2be   : > { %v3807_v35 = vpop.f32.mrb[32].mxu1  ;;  %3962 = vmatprep.mubr.f32.mxu0 %v1445_v22 }
 0x2bf   : > { %v1191_v30 = vpop.f32.mrb[33].mxu1  ;;  %3963 = vmatmul.mubr.f32.gmra.mrb[94].mxu0 %v1446_v0  ;;  %v1448_v38 = vmax.f32 %v3807_v35, 0.0 }
 0x2c0   : > { %v1447_v24 = vmax.f32 %v1191_v30, 0.0 }
 0x2c2   : > { %v3810_v23 = vpop.f32.mrb[34].mxu1  ;;  %3965 = vmatprep.mubr.f32.mxu0 %v1447_v24 }
 0x2c3   : > { %v1201_v43 = vpop.f32.mrb[35].mxu1  ;;  %3966 = vmatmul.mubr.f32.gmra.mrb[96].mxu0 %v1448_v38  ;;  %v1450_v13 = vmax.f32 %v3810_v23, 0.0 }
 0x2c4   : > { %v1449_v16 = vmax.f32 %v1201_v43, 0.0 }
 0x2c6   : > { %v3813_v10 = vpop.f32.mrb[36].mxu1  ;;  %3968 = vmatprep.mubr.f32.mxu0 %v1449_v16 }
 0x2c7   : > { %v1211_v48 = vpop.f32.mrb[37].mxu1  ;;  %3969 = vmatmul.mubr.f32.gmra.mrb[98].mxu0 %v1450_v13  ;;  %v1452_v6 = vmax.f32 %v3813_v10, 0.0 }
 0x2c8   : > { %v1451_v51 = vmax.f32 %v1211_v48, 0.0 }
 0x2ca   : > { %v3816_v2 = vpop.f32.mrb[38].mxu1  ;;  %3971 = vmatprep.mubr.f32.mxu0 %v1451_v51 }
 0x2cb   : > { %v1221_v56 = vpop.f32.mrb[39].mxu1  ;;  %3972 = vmatmul.mubr.f32.gmra.mrb[100].mxu0 %v1452_v6  ;;  %v1454_v0 = vmax.f32 %v3816_v2, 0.0 }
 0x2cc   : > { %v1453_v22 = vmax.f32 %v1221_v56, 0.0 }
 0x2ce   : > { %v3819_v30 = vpop.f32.mrb[40].mxu1  ;;  %3974 = vmatprep.mubr.f32.mxu0 %v1453_v22 }
 0x2cf   : > { %v1231_v35 = vpop.f32.mrb[41].mxu1  ;;  %3975 = vmatmul.mubr.f32.gmra.mrb[102].mxu0 %v1454_v0  ;;  %v1456_v38 = vmax.f32 %v3819_v30, 0.0 }
 0x2d0   : > { %v1455_v24 = vmax.f32 %v1231_v35, 0.0 }
 0x2d2   : > { %v3822_v43 = vpop.f32.mrb[42].mxu1  ;;  %3977 = vmatprep.mubr.f32.mxu0 %v1455_v24 }
 0x2d3   : > { %v1241_v23 = vpop.f32.mrb[43].mxu1  ;;  %3978 = vmatmul.mubr.f32.gmra.mrb[104].mxu0 %v1456_v38  ;;  %v1458_v13 = vmax.f32 %v3822_v43, 0.0 }
 0x2d4   : > { %v1457_v16 = vmax.f32 %v1241_v23, 0.0 }
 0x2d6   : > { %v3825_v48 = vpop.f32.mrb[44].mxu1  ;;  %3980 = vmatprep.mubr.f32.mxu0 %v1457_v16 }
 0x2d7   : > { %v1251_v10 = vpop.f32.mrb[45].mxu1  ;;  %3981 = vmatmul.mubr.f32.gmra.mrb[106].mxu0 %v1458_v13  ;;  %v1460_v6 = vmax.f32 %v3825_v48, 0.0 }
 0x2d8   : > { %v1459_v51 = vmax.f32 %v1251_v10, 0.0 }
 0x2da   : > { %v3828_v56 = vpop.f32.mrb[46].mxu1  ;;  %3983 = vmatprep.mubr.f32.mxu0 %v1459_v51 }
 0x2db   : > { %v1261_v2 = vpop.f32.mrb[47].mxu1  ;;  %3984 = vmatmul.mubr.f32.gmra.mrb[108].mxu0 %v1460_v6  ;;  %v1462_v0 = vmax.f32 %v3828_v56, 0.0 }
 0x2dc   : > { %v1461_v22 = vmax.f32 %v1261_v2, 0.0 }
 0x2de   : > { %v3863_v35 = vpop.f32.mrb[48].mxu1  ;;  %3986 = vmatprep.mubr.f32.mxu0 %v1461_v22 }
 0x2df   : > { %v1336_v30 = vpop.f32.mrb[49].mxu1  ;;  %3987 = vmatmul.mubr.f32.gmra.mrb[110].mxu0 %v1462_v0  ;;  %v1464_v38 = vmax.f32 %v3863_v35, 0.0 }
 0x2e0   : > { %v1463_v24 = vmax.f32 %v1336_v30, 0.0 }
 0x2e2   : > { %v3866_v23 = vpop.f32.mrb[50].mxu1  ;;  %3989 = vmatprep.mubr.f32.mxu0 %v1463_v24 }
 0x2e3   : > { %v1346_v43 = vpop.f32.mrb[51].mxu1  ;;  %3990 = vmatmul.mubr.f32.gmra.mrb[112].mxu0 %v1464_v38  ;;  %v1466_v13 = vmax.f32 %v3866_v23, 0.0 }
 0x2e4   : > { %v1465_v16 = vmax.f32 %v1346_v43, 0.0 }
 0x2e6   : > { %v3869_v10 = vpop.f32.mrb[52].mxu1  ;;  %3992 = vmatprep.mubr.f32.mxu0 %v1465_v16 }
 0x2e7   : > { %v1356_v48 = vpop.f32.mrb[53].mxu1  ;;  %3993 = vmatmul.mubr.f32.gmra.mrb[114].mxu0 %v1466_v13  ;;  %v1468_v6 = vmax.f32 %v3869_v10, 0.0 }
 0x2e8   : > { %v1467_v51 = vmax.f32 %v1356_v48, 0.0 }
 0x2ea   : > { %v3872_v2 = vpop.f32.mrb[54].mxu1  ;;  %3995 = vmatprep.mubr.f32.mxu0 %v1467_v51 }
 0x2eb   : > { %v1366_v56 = vpop.f32.mrb[55].mxu1  ;;  %3996 = vmatmul.mubr.f32.gmra.mrb[116].mxu0 %v1468_v6  ;;  %v1470_v0 = vmax.f32 %v3872_v2, 0.0 }
 0x2ec   : > { %v1469_v22 = vmax.f32 %v1366_v56, 0.0 }
 0x2ee   : > { %v3875_v30 = vpop.f32.mrb[56].mxu1  ;;  %3998 = vmatprep.mubr.f32.mxu0 %v1469_v22 }
 0x2ef   : > { %v1376_v35 = vpop.f32.mrb[57].mxu1  ;;  %3999 = vmatmul.mubr.f32.gmra.mrb[118].mxu0 %v1470_v0  ;;  %v1472_v38 = vmax.f32 %v3875_v30, 0.0 }
 0x2f0   : > { %v1471_v24 = vmax.f32 %v1376_v35, 0.0 }
 0x2f2   : > { %v3878_v43 = vpop.f32.mrb[58].mxu1  ;;  %4001 = vmatprep.mubr.f32.mxu0 %v1471_v24 }
 0x2f3   : > { %v1386_v23 = vpop.f32.mrb[59].mxu1  ;;  %4002 = vmatmul.mubr.f32.gmra.mrb[120].mxu0 %v1472_v38  ;;  %v1474_v13 = vmax.f32 %v3878_v43, 0.0 }
 0x2f4   : > { %v1473_v16 = vmax.f32 %v1386_v23, 0.0 }
 0x2f6   : > { %v3881_v48 = vpop.f32.mrb[60].mxu1  ;;  %4004 = vmatprep.mubr.f32.mxu0 %v1473_v16 }
 0x2f7   : > { %v1396_v10 = vpop.f32.mrb[61].mxu1  ;;  %4005 = vmatmul.mubr.f32.gmra.mrb[122].mxu0 %v1474_v13  ;;  %v1476_v6 = vmax.f32 %v3881_v48, 0.0 }
 0x2f8   : > { %v1475_v51 = vmax.f32 %v1396_v10, 0.0 }
 0x2fa   : > { %v3884_v56 = vpop.f32.mrb[62].mxu1  ;;  %4007 = vmatprep.mubr.f32.mxu0 %v1475_v51 }
 0x2fb   : > { %v1406_v2 = vpop.f32.mrb[63].mxu1  ;;  %4008 = vmatmul.mubr.f32.gmra.mrb[124].mxu0 %v1476_v6  ;;  %v1478_v0 = vmax.f32 %v3884_v56, 0.0 }
 0x2fc   : > { %v1477_v22 = vmax.f32 %v1406_v2, 0.0 }
 0x2fe   : > { %4010 = vmatprep.mubr.f32.mxu0 %v1477_v22 }
 0x2ff   : > { %4011 = vmatmul.mubr.f32.gmra.mrb[126].mxu0 %v1478_v0 }
 0x356   : > { %v3919_v30 = vpop.f32.mrb[64].mxu0 }
 0x357   : > { %v1545_v35 = vpop.f32.mrb[65].mxu0 }
 0x358   : > { %v4429_v24 = vpack.c.bf16 %v3919_v30, %v1545_v35 }
 0x35a   : > { %v3922_v38 = vpop.f32.mrb[66].mxu0  ;;  %4430 = vmatprep.subr.bf16.mxu1 %v4429_v24 }
 0x35b   : > { %v1555_v43 = vpop.f32.mrb[67].mxu0  ;;  %4432 = vmatpush3.bf16.msra.mxu1 %v4429_v24 }
 0x35c   : > { %v4433_v23 = vpack.c.bf16 %v3922_v38, %v1555_v43 }
 0x35e   : > { %v3925_v16 = vpop.f32.mrb[68].mxu0  ;;  %4434 = vmatprep.subr.bf16.mxu1 %v4433_v23 }
 0x35f   : > { %v1565_v13 = vpop.f32.mrb[69].mxu0  ;;  %4436 = vmatpush3.bf16.msra.mxu1 %v4433_v23 }
 0x360   : > { %v4437_v48 = vpack.c.bf16 %v3925_v16, %v1565_v13 }
 0x362   : > { %v3928_v10 = vpop.f32.mrb[70].mxu0  ;;  %4438 = vmatprep.subr.bf16.mxu1 %v4437_v48 }
 0x363   : > { %v1575_v51 = vpop.f32.mrb[71].mxu0  ;;  %4440 = vmatpush3.bf16.msra.mxu1 %v4437_v48 }
 0x364   : > { %v4441_v6 = vpack.c.bf16 %v3928_v10, %v1575_v51 }
 0x366   : > { %v3931_v56 = vpop.f32.mrb[72].mxu0  ;;  %4442 = vmatprep.subr.bf16.mxu1 %v4441_v6 }
 0x367   : > { %v1585_v2 = vpop.f32.mrb[73].mxu0  ;;  %4444 = vmatpush3.bf16.msra.mxu1 %v4441_v6 }
 0x368   : > { %v4445_v22 = vpack.c.bf16 %v3931_v56, %v1585_v2 }
 0x36a   : > { %v3934_v0 = vpop.f32.mrb[74].mxu0  ;;  %4446 = vmatprep.subr.bf16.mxu1 %v4445_v22 }
 0x36b   : > { %v1595_v30 = vpop.f32.mrb[75].mxu0  ;;  %4448 = vmatpush3.bf16.msra.mxu1 %v4445_v22 }
 0x36c   : > { %v4449_v35 = vpack.c.bf16 %v3934_v0, %v1595_v30 }
 0x36e   : > { %v3937_v24 = vpop.f32.mrb[76].mxu0  ;;  %4450 = vmatprep.subr.bf16.mxu1 %v4449_v35 }
 0x36f   : > { %v1605_v38 = vpop.f32.mrb[77].mxu0  ;;  %4452 = vmatpush3.bf16.msra.mxu1 %v4449_v35 }
 0x370   : > { %v4453_v43 = vpack.c.bf16 %v3937_v24, %v1605_v38 }
 0x372   : > { %v3940_v23 = vpop.f32.mrb[78].mxu0  ;;  %4454 = vmatprep.subr.bf16.mxu1 %v4453_v43 }
 0x373   : > { %v1615_v16 = vpop.f32.mrb[79].mxu0  ;;  %4456 = vmatpush3.bf16.msra.mxu1 %v4453_v43 }
 0x374   : > { %v4457_v13 = vpack.c.bf16 %v3940_v23, %v1615_v16 }
 0x376   : > { %v3943_v48 = vpop.f32.mrb[80].mxu0  ;;  %4458 = vmatprep.subr.bf16.mxu1 %v4457_v13 }
 0x377   : > { %v1625_v10 = vpop.f32.mrb[81].mxu0  ;;  %4460 = vmatpush3.bf16.msra.mxu1 %v4457_v13 }
 0x378   : > { %v4461_v51 = vpack.c.bf16 %v3943_v48, %v1625_v10 }
 0x37a   : > { %v3946_v6 = vpop.f32.mrb[82].mxu0  ;;  %4046 = vmatmul.mubr.f32.vlgmr.msra.gmra.mrb[64].mxu1 %v5326_v63  ;;  %4462 = vmatprep.subr.bf16.mxu1 %v4461_v51 }
 0x37b   : > { %v1635_v56 = vpop.f32.mrb[83].mxu0  ;;  %4464 = vmatpush3.bf16.msra.mxu1 %v4461_v51  ;;  %4048 = vmatprep.mubr.f32.mxu1 %v5329_v3 }
 0x37c   : > { %v4465_v2 = vpack.c.bf16 %v3946_v6, %v1635_v56 }
 0x37e   : > { %v3949_v22 = vpop.f32.mrb[84].mxu0  ;;  %4049 = vmatmul.mubr.f32.gmra.mrb[66].mxu1 %v5334_v9  ;;  %4466 = vmatprep.subr.bf16.mxu1 %v4465_v2 }
 0x37f   : > { %v1645_v0 = vpop.f32.mrb[85].mxu0  ;;  %4468 = vmatpush3.bf16.msra.mxu1 %v4465_v2  ;;  %4051 = vmatprep.mubr.f32.mxu1 %v5337_v11 }
 0x380   : > { %v4469_v30 = vpack.c.bf16 %v3949_v22, %v1645_v0 }
 0x382   : > { %v3952_v35 = vpop.f32.mrb[86].mxu0  ;;  %4052 = vmatmul.mubr.f32.gmra.mrb[68].mxu1 %v5342_v17  ;;  %4470 = vmatprep.subr.bf16.mxu1 %v4469_v30 }
 0x383   : > { %v1655_v63 = vpop.f32.mrb[87].mxu0  ;;  %4472 = vmatpush3.bf16.msra.mxu1 %v4469_v30  ;;  %4054 = vmatprep.mubr.f32.mxu1 %v5345_v19 }
 0x384   : > { %v4473_v24 = vpack.c.bf16 %v3952_v35, %v1655_v63 }
 0x386   : > { %v3955_v3 = vpop.f32.mrb[88].mxu0  ;;  %4055 = vmatmul.mubr.f32.gmra.mrb[70].mxu1 %v5350_v26  ;;  %4474 = vmatprep.subr.bf16.mxu1 %v4473_v24 }
 0x387   : > { %v1665_v9 = vpop.f32.mrb[89].mxu0  ;;  %4476 = vmatpush3.bf16.msra.mxu1 %v4473_v24  ;;  %4057 = vmatprep.mubr.f32.mxu1 %v5353_v28 }
 0x388   : > { %v4477_v38 = vpack.c.bf16 %v3955_v3, %v1665_v9 }
 0x38a   : > { %v3958_v11 = vpop.f32.mrb[90].mxu0  ;;  %4058 = vmatmul.mubr.f32.gmra.mrb[72].mxu1 %v5358_v32  ;;  %4478 = vmatprep.subr.bf16.mxu1 %v4477_v38 }
 0x38b   : > { %v1675_v17 = vpop.f32.mrb[91].mxu0  ;;  %4480 = vmatpush3.bf16.msra.mxu1 %v4477_v38  ;;  %4060 = vmatprep.mubr.f32.mxu1 %v5361_v34 }
 0x38c   : > { %v4481_v43 = vpack.c.bf16 %v3958_v11, %v1675_v17  ;;  %v6478_v11 = vld [vmem:[#allocation19_spill] sm:$0xff]  ;;  %v6480_v17 = vld [vmem:[#allocation21_spill] sm:$0xff] }
 0x38e   : > { %v3961_v19 = vpop.f32.mrb[92].mxu0  ;;  %4061 = vmatmul.mubr.f32.gmra.mrb[74].mxu1 %v5366_v37  ;;  %4482 = vmatprep.subr.bf16.mxu1 %v4481_v43 }
 0x38f   : > { %v1685_v26 = vpop.f32.mrb[93].mxu0  ;;  %4484 = vmatpush3.bf16.msra.mxu1 %v4481_v43  ;;  %4063 = vmatprep.mubr.f32.mxu1 %v5369_v39  ;;  %v6482_v43 = vld [vmem:[#allocation23_spill] sm:$0xff] }
 0x390   : > { %v4485_v23 = vpack.c.bf16 %v3961_v19, %v1685_v26  ;;  %v6484_v19 = vld [vmem:[#allocation25_spill] sm:$0xff]  ;;  %v6486_v26 = vld [vmem:[#allocation27_spill] sm:$0xff] }
 0x392   : > { %v3964_v28 = vpop.f32.mrb[94].mxu0  ;;  %4064 = vmatmul.mubr.f32.gmra.mrb[76].mxu1 %v5374_v42  ;;  %4486 = vmatprep.subr.bf16.mxu1 %v4485_v23 }
 0x393   : > { %v1695_v32 = vpop.f32.mrb[95].mxu0  ;;  %4488 = vmatpush3.bf16.msra.mxu1 %v4485_v23  ;;  %4066 = vmatprep.mubr.f32.mxu1 %v5377_v44  ;;  %v6487_v23 = vld [vmem:[#allocation28_spill] sm:$0xff] }
 0x394   : > { %v4489_v16 = vpack.c.bf16 %v3964_v28, %v1695_v32  ;;  %v6488_v28 = vld [vmem:[#allocation29_spill] sm:$0xff]  ;;  %v6489_v32 = vld [vmem:[#allocation30_spill] sm:$0xff] }
 0x396   : > { %v3967_v34 = vpop.f32.mrb[96].mxu0  ;;  %4067 = vmatmul.mubr.f32.gmra.mrb[78].mxu1 %v5382_v47  ;;  %4490 = vmatprep.subr.bf16.mxu1 %v4489_v16 }
 0x397   : > { %v1705_v37 = vpop.f32.mrb[97].mxu0  ;;  %4492 = vmatpush3.bf16.msra.mxu1 %v4489_v16  ;;  %4101 = vmatprep.mubr.f32.mxu1 %v5385_v49 }
 0x398   : > { %v4493_v13 = vpack.c.bf16 %v3967_v34, %v1705_v37 }
 0x39a   : > { %v3970_v39 = vpop.f32.mrb[98].mxu0  ;;  %4102 = vmatmul.mubr.f32.vlgmr.msra.gmra.mrb[80].mxu1 %v5390_v52  ;;  %4494 = vmatprep.subr.bf16.mxu1 %v4493_v13 }
 0x39b   : > { %v1715_v42 = vpop.f32.mrb[99].mxu0  ;;  %4496 = vmatpush3.bf16.msra.mxu1 %v4493_v13  ;;  %4104 = vmatprep.mubr.f32.mxu1 %v5393_v54 }
 0x39c   : > { %v4497_v48 = vpack.c.bf16 %v3970_v39, %v1715_v42 }
 0x39e   : > { %v3973_v44 = vpop.f32.mrb[100].mxu0  ;;  %4105 = vmatmul.mubr.f32.gmra.mrb[82].mxu1 %v5398_v57  ;;  %4498 = vmatprep.subr.bf16.mxu1 %v4497_v48 }
 0x39f   : > { %v1725_v47 = vpop.f32.mrb[101].mxu0  ;;  %4500 = vmatpush3.bf16.msra.mxu1 %v4497_v48  ;;  %4107 = vmatprep.mubr.f32.mxu1 %v5401_v59 }
 0x3a0   : > { %v4501_v10 = vpack.c.bf16 %v3973_v44, %v1725_v47 }
 0x3a2   : > { %v3976_v49 = vpop.f32.mrb[102].mxu0  ;;  %4108 = vmatmul.mubr.f32.gmra.mrb[84].mxu1 %v5406_v62  ;;  %4502 = vmatprep.subr.bf16.mxu1 %v4501_v10 }
 0x3a3   : > { %v1735_v52 = vpop.f32.mrb[103].mxu0  ;;  %4504 = vmatpush3.bf16.msra.mxu1 %v4501_v10  ;;  %4110 = vmatprep.mubr.f32.mxu1 %v5409_v1 }
 0x3a4   : > { %v4505_v51 = vpack.c.bf16 %v3976_v49, %v1735_v52 }
 0x3a6   : > { %v3979_v54 = vpop.f32.mrb[104].mxu0  ;;  %4111 = vmatmul.mubr.f32.gmra.mrb[86].mxu1 %v5414_v5  ;;  %4506 = vmatprep.subr.bf16.mxu1 %v4505_v51 }
 0x3a7   : > { %v1745_v57 = vpop.f32.mrb[105].mxu0  ;;  %4508 = vmatpush3.bf16.msra.mxu1 %v4505_v51  ;;  %4113 = vmatprep.mubr.f32.mxu1 %v5417_v7 }
 0x3a8   : > { %v4509_v6 = vpack.c.bf16 %v3979_v54, %v1745_v57 }
 0x3aa   : > { %v3982_v59 = vpop.f32.mrb[106].mxu0  ;;  %4114 = vmatmul.mubr.f32.gmra.mrb[88].mxu1 %v5422_v12  ;;  %4510 = vmatprep.subr.bf16.mxu1 %v4509_v6 }
 0x3ab   : > { %v1755_v62 = vpop.f32.mrb[107].mxu0  ;;  %4512 = vmatpush3.bf16.msra.mxu1 %v4509_v6  ;;  %4116 = vmatprep.mubr.f32.mxu1 %v5425_v14 }
 0x3ac   : > { %v4513_v56 = vpack.c.bf16 %v3982_v59, %v1755_v62 }
 0x3ae   : > { %v3985_v1 = vpop.f32.mrb[108].mxu0  ;;  %4117 = vmatmul.mubr.f32.gmra.mrb[90].mxu1 %v5430_v18  ;;  %4514 = vmatprep.subr.bf16.mxu1 %v4513_v56 }
 0x3af   : > { %v1765_v5 = vpop.f32.mrb[109].mxu0  ;;  %4516 = vmatpush3.bf16.msra.mxu1 %v4513_v56  ;;  %4119 = vmatprep.mubr.f32.mxu1 %v5433_v21 }
 0x3b0   : > { %v4517_v2 = vpack.c.bf16 %v3985_v1, %v1765_v5 }
 0x3b2   : > { %v3988_v7 = vpop.f32.mrb[110].mxu0  ;;  %4120 = vmatmul.mubr.f32.gmra.mrb[92].mxu1 %v5438_v25  ;;  %4518 = vmatprep.subr.bf16.mxu1 %v4517_v2 }
 0x3b3   : > { %v1775_v12 = vpop.f32.mrb[111].mxu0  ;;  %4520 = vmatpush3.bf16.msra.mxu1 %v4517_v2  ;;  %4122 = vmatprep.mubr.f32.mxu1 %v5441_v29 }
 0x3b4   : > { %v4521_v22 = vpack.c.bf16 %v3988_v7, %v1775_v12 }
 0x3b6   : > { %v3991_v14 = vpop.f32.mrb[112].mxu0  ;;  %4123 = vmatmul.mubr.f32.gmra.mrb[94].mxu1 %v5446_v33  ;;  %4522 = vmatprep.subr.bf16.mxu1 %v4521_v22 }
 0x3b7   : > { %v1785_v18 = vpop.f32.mrb[113].mxu0  ;;  %4524 = vmatpush3.bf16.msra.mxu1 %v4521_v22  ;;  %4157 = vmatprep.mubr.f32.mxu1 %v5449_v36 }
 0x3b8   : > { %v4525_v0 = vpack.c.bf16 %v3991_v14, %v1785_v18 }
 0x3ba   : > { %v3994_v21 = vpop.f32.mrb[114].mxu0  ;;  %4158 = vmatmul.mubr.f32.vlgmr.msra.gmra.mrb[96].mxu1 %v5454_v41  ;;  %4526 = vmatprep.subr.bf16.mxu1 %v4525_v0 }
 0x3bb   : > { %v1795_v25 = vpop.f32.mrb[115].mxu0  ;;  %4528 = vmatpush3.bf16.msra.mxu1 %v4525_v0  ;;  %4160 = vmatprep.mubr.f32.mxu1 %v5457_v45 }
 0x3bc   : > { %v4529_v30 = vpack.c.bf16 %v3994_v21, %v1795_v25 }
 0x3be   : > { %v3997_v29 = vpop.f32.mrb[116].mxu0  ;;  %4161 = vmatmul.mubr.f32.gmra.mrb[98].mxu1 %v5462_v50  ;;  %4530 = vmatprep.subr.bf16.mxu1 %v4529_v30 }
 0x3bf   : > { %v1805_v33 = vpop.f32.mrb[117].mxu0  ;;  %4532 = vmatpush3.bf16.msra.mxu1 %v4529_v30  ;;  %4163 = vmatprep.mubr.f32.mxu1 %v5465_v53 }
 0x3c0   : > { %v4533_v35 = vpack.c.bf16 %v3997_v29, %v1805_v33 }
 0x3c2   : > { %v4000_v36 = vpop.f32.mrb[118].mxu0  ;;  %4164 = vmatmul.mubr.f32.gmra.mrb[100].mxu1 %v5470_v58  ;;  %4534 = vmatprep.subr.bf16.mxu1 %v4533_v35 }
 0x3c3   : > { %v1815_v41 = vpop.f32.mrb[119].mxu0  ;;  %4536 = vmatpush3.bf16.msra.mxu1 %v4533_v35  ;;  %4166 = vmatprep.mubr.f32.mxu1 %v5473_v61 }
 0x3c4   : > { %v4537_v63 = vpack.c.bf16 %v4000_v36, %v1815_v41 }
 0x3c6   : > { %v4003_v45 = vpop.f32.mrb[120].mxu0  ;;  %4167 = vmatmul.mubr.f32.gmra.mrb[102].mxu1 %v5478_v4  ;;  %4538 = vmatprep.subr.bf16.mxu1 %v4537_v63 }
 0x3c7   : > { %v1825_v50 = vpop.f32.mrb[121].mxu0  ;;  %4540 = vmatpush3.bf16.msra.mxu1 %v4537_v63  ;;  %4169 = vmatprep.mubr.f32.mxu1 %v5481_v8 }
 0x3c8   : > { %v4541_v24 = vpack.c.bf16 %v4003_v45, %v1825_v50 }
 0x3ca   : > { %v4006_v53 = vpop.f32.mrb[122].mxu0  ;;  %4170 = vmatmul.mubr.f32.gmra.mrb[104].mxu1 %v5486_v15  ;;  %4542 = vmatprep.subr.bf16.mxu1 %v4541_v24 }
 0x3cb   : > { %v1835_v58 = vpop.f32.mrb[123].mxu0  ;;  %4544 = vmatpush3.bf16.msra.mxu1 %v4541_v24  ;;  %4172 = vmatprep.mubr.f32.mxu1 %v5489_v20  ;;  %v6475_v20 = vld [vmem:[#allocation16_spill] sm:$0xff] }
 0x3cc   : > { %v4545_v3 = vpack.c.bf16 %v4006_v53, %v1835_v58 }
 0x3ce   : > { %v4009_v61 = vpop.f32.mrb[124].mxu0  ;;  %4173 = vmatmul.mubr.f32.gmra.mrb[106].mxu1 %v5494_v27  ;;  %4546 = vmatprep.subr.bf16.mxu1 %v4545_v3  ;;  %v6476_v27 = vld [vmem:[#allocation17_spill] sm:$0xff] }
 0x3cf   : > { %v1845_v4 = vpop.f32.mrb[125].mxu0  ;;  %4548 = vmatpush3.bf16.msra.mxu1 %v4545_v3  ;;  %4175 = vmatprep.mubr.f32.mxu1 %v5497_v31  ;;  %v6477_v31 = vld [vmem:[#allocation18_spill] sm:$0xff] }
 0x3d0   : > { %v4549_v9 = vpack.c.bf16 %v4009_v61, %v1845_v4 }
 0x3d2   : > { %v4012_v8 = vpop.f32.mrb[126].mxu0  ;;  %4176 = vmatmul.mubr.f32.gmra.mrb[108].mxu1 %v5502_v40  ;;  %4550 = vmatprep.subr.bf16.mxu1 %v4549_v9  ;;  %v6479_v40 = vld [vmem:[#allocation20_spill] sm:$0xff] }
 0x3d3   : > { %v1855_v15 = vpop.f32.mrb[127].mxu0  ;;  %4552 = vmatpush3.bf16.msra.mxu1 %v4549_v9  ;;  %4178 = vmatprep.mubr.f32.mxu1 %v5505_v46  ;;  %v6481_v46 = vld [vmem:[#allocation22_spill] sm:$0xff] }
 0x3d4   : > { %v4553_v38 = vpack.c.bf16 %v4012_v8, %v1855_v15 }
 0x3d6   : > { %4179 = vmatmul.mubr.f32.gmra.mrb[110].mxu1 %v5510_v55  ;;  %4554 = vmatprep.subr.bf16.mxu1 %v4553_v38  ;;  %v6483_v55 = vld [vmem:[#allocation24_spill] sm:$0xff] }
 0x3d7   : > { %4556 = vmatpush3.bf16.msra.mxu1 %v4553_v38  ;;  %4213 = vmatprep.mubr.f32.mxu1 %v5513_v60  ;;  %v6485_v60 = vld [vmem:[#allocation26_spill] sm:$0xff] }
 0x3da   : > { %4214 = vmatmul.mubr.f32.vlgmr.msra.gmra.mrb[112].mxu1 %v6475_v20 }
 0x3db   : > { %4216 = vmatprep.mubr.f32.mxu1 %v6476_v27 }
 0x3de   : > { %4217 = vmatmul.mubr.f32.gmra.mrb[114].mxu1 %v6477_v31 }
 0x3df   : > { %4219 = vmatprep.mubr.f32.mxu1 %v6478_v11 }
 0x3e2   : > { %4220 = vmatmul.mubr.f32.gmra.mrb[116].mxu1 %v6479_v40 }
 0x3e3   : > { %4222 = vmatprep.mubr.f32.mxu1 %v6480_v17 }
 0x3e6   : > { %4223 = vmatmul.mubr.f32.gmra.mrb[118].mxu1 %v6481_v46 }
 0x3e7   : > { %4225 = vmatprep.mubr.f32.mxu1 %v6482_v43 }
 0x3ea   : > { %4226 = vmatmul.mubr.f32.gmra.mrb[120].mxu1 %v6483_v55 }
 0x3eb   : > { %4228 = vmatprep.mubr.f32.mxu1 %v6484_v19 }
 0x3ee   : > { %4229 = vmatmul.mubr.f32.gmra.mrb[122].mxu1 %v6485_v60 }
 0x3ef   : > { %4231 = vmatprep.mubr.f32.mxu1 %v6486_v26 }
 0x3f2   : > { %4232 = vmatmul.mubr.f32.gmra.mrb[124].mxu1 %v6487_v23 }
 0x3f3   : > { %4234 = vmatprep.mubr.f32.mxu1 %v6488_v28 }
 0x3f6   : > { %4235 = vmatmul.mubr.f32.gmra.mrb[126].mxu1 %v6489_v32 }
 0x44d   : > { %v5641_v16 = vpop.f32.mrb[64].mxu1 }
 0x44e   : > { %v5643_v34 = vpop.f32.mrb[65].mxu1 }
 0x44f   : > { %v2444_v37 = vmax.f32 %v5643_v34, %v5641_v16 }
 0x451   : > { %v5647_v13 = vpop.f32.mrb[66].mxu1 }
 0x452   : > { %v5649_v39 = vpop.f32.mrb[67].mxu1 }
 0x453   : > { %v2445_v42 = vmax.f32 %v2444_v37, %v5649_v39 }
 0x455   : > { %v5652_v48 = vpop.f32.mrb[68].mxu1  ;;  %v2446_v44 = vmax.f32 %v2445_v42, %v5647_v13 }
 0x456   : > { %v5655_v47 = vpop.f32.mrb[69].mxu1 }
 0x457   : > { %v2447_v10 = vmax.f32 %v2446_v44, %v5655_v47 }
 0x459   : > { %v5658_v49 = vpop.f32.mrb[70].mxu1  ;;  %v2448_v52 = vmax.f32 %v2447_v10, %v5652_v48 }
 0x45a   : > { %v5661_v51 = vpop.f32.mrb[71].mxu1 }
 0x45b   : > { %v2449_v54 = vmax.f32 %v2448_v52, %v5661_v51 }
 0x45d   : > { %v5664_v57 = vpop.f32.mrb[72].mxu1  ;;  %v2450_v6 = vmax.f32 %v2449_v54, %v5658_v49 }
 0x45e   : > { %v5667_v59 = vpop.f32.mrb[73].mxu1 }
 0x45f   : > { %v2451_v62 = vmax.f32 %v2450_v6, %v5667_v59 }
 0x461   : > { %v5670_v56 = vpop.f32.mrb[74].mxu1  ;;  %v2452_v1 = vmax.f32 %v2451_v62, %v5664_v57 }
 0x462   : > { %v5673_v5 = vpop.f32.mrb[75].mxu1 }
 0x463   : > { %v2453_v2 = vmax.f32 %v2452_v1, %v5673_v5 }
 0x465   : > { %v5676_v7 = vpop.f32.mrb[76].mxu1  ;;  %v2454_v12 = vmax.f32 %v2453_v2, %v5670_v56 }
 0x466   : > { %v5679_v22 = vpop.f32.mrb[77].mxu1 }
 0x467   : > { %v2455_v14 = vmax.f32 %v2454_v12, %v5679_v22 }
 0x469   : > { %v5682_v18 = vpop.f32.mrb[78].mxu1  ;;  %v2456_v0 = vmax.f32 %v2455_v14, %v5676_v7 }
 0x46a   : > { %v5685_v21 = vpop.f32.mrb[79].mxu1 }
 0x46b   : > { %v2457_v25 = vmax.f32 %v2456_v0, %v5685_v21 }
 0x46d   : > { %v2458_v30 = vmax.f32 %v2457_v25, %v5682_v18  ;;  %v5689_v29 = vpop.f32.mrb[80].mxu1 }
 0x46e   : > { %v5691_v33 = vpop.f32.mrb[81].mxu1 }
 0x46f   : > { %v2459_v35 = vrot.slane %v2458_v30, 4  ;;  %v2465_v36 = vmax.f32 %v5691_v33, %v5689_v29 }
 0x471   : > { %v2460_v41 = vmax.f32 %v2458_v30, %v2459_v35  ;;  %v5695_v63 = vpop.f32.mrb[82].mxu1 }
 0x472   : > { %v5697_v45 = vpop.f32.mrb[83].mxu1 }
 0x473   : > { %v2461_v50 = vrot.slane %v2460_v41, 2  ;;  %v2466_v24 = vmax.f32 %v2465_v36, %v5697_v45 }
 0x475   : > { %v2462_v53 = vmax.f32 %v2460_v41, %v2461_v50  ;;  %v5700_v58 = vpop.f32.mrb[84].mxu1  ;;  %v2467_v3 = vmax.f32 %v2466_v24, %v5695_v63 }
 0x476   : > { %v5703_v61 = vpop.f32.mrb[85].mxu1 }
 0x477   : > { %v2463_v4 = vrot.slane %v2462_v53, 1  ;;  %v2468_v9 = vmax.f32 %v2467_v3, %v5703_v61 }
 0x479   : > { %v5706_v8 = vmax.f32 %v2462_v53, %v2463_v4  ;;  %v5708_v15 = vpop.f32.mrb[86].mxu1  ;;  %v2469_v38 = vmax.f32 %v2468_v9, %v5700_v58 }
 0x47a   : > { %v5711_v20 = vpop.f32.mrb[87].mxu1 }
 0x47b   : > { %v2528_v27 = vsub.f32 %v5643_v34, %v5706_v8  ;;  %v2529_v31 = vsub.f32 %v5641_v16, %v5706_v8  ;;  %v2530_v11 = vsub.f32 %v5649_v39, %v5706_v8  ;;  %v2531_v40 = vsub.f32 %v5647_v13, %v5706_v8 }
 0x47c   : > { %v2532_v17 = vsub.f32 %v5655_v47, %v5706_v8  ;;  %v2533_v46 = vsub.f32 %v5652_v48, %v5706_v8  ;;  %v2534_v43 = vsub.f32 %v5661_v51, %v5706_v8  ;;  %v2535_v55 = vsub.f32 %v5658_v49, %v5706_v8 }
 0x47d   : > { %v2536_v19 = vsub.f32 %v5667_v59, %v5706_v8  ;;  %v2537_v60 = vsub.f32 %v5664_v57, %v5706_v8  ;;  %v2538_v26 = vsub.f32 %v5673_v5, %v5706_v8  ;;  %v2539_v23 = vsub.f32 %v5670_v56, %v5706_v8  ;;  %v5737_v28 = vpop.f32.mrb[88].mxu1 }
 0x47e   : > { %v2540_v32 = vsub.f32 %v5679_v22, %v5706_v8  ;;  %v2541_v16 = vsub.f32 %v5676_v7, %v5706_v8  ;;  %v2542_v34 = vsub.f32 %v5685_v21, %v5706_v8  ;;  %v2543_v37 = vsub.f32 %v5682_v18, %v5706_v8  ;;  %v5747_v13 = vpop.f32.mrb[89].mxu1 }
 0x47f   : > { %v2592_v39 = vmul.f32 1.442695, %v2528_v27  ;;  %v2594_v42 = vmul.f32 1.442695, %v2529_v31  ;;  %v2470_v48 = vmax.f32 %v2469_v38, %v5711_v20  ;;  %v2596_v44 = vmul.f32 1.442695, %v2530_v11 }
 0x480   : > { %v2598_v47 = vmul.f32 1.442695, %v2531_v40  ;;  %v2600_v10 = vmul.f32 1.442695, %v2532_v17  ;;  %v2602_v54 = vmul.f32 1.442695, %v2533_v46 }
 0x481   : > { %4633 = vpow2.f32 %v2592_v39  ;;  %v2471_v49 = vmax.f32 %v2470_v48, %v5708_v15  ;;  %v5751_v52 = vpop.f32.mrb[90].mxu1  ;;  %v2604_v62 = vmul.f32 1.442695, %v2534_v43  ;;  %v2606_v5 = vmul.f32 1.442695, %v2535_v55 }
 0x482   : > { %4635 = vpow2.f32 %v2594_v42  ;;  %v5753_v51 = vpop.f32.mrb[91].mxu1  ;;  %v2608_v0 = vmul.f32 1.442695, %v2536_v19  ;;  %v2610_v41 = vmul.f32 1.442695, %v2537_v60 }
 0x483   : > { %4637 = vpow2.f32 %v2596_v44  ;;  %v2472_v57 = vmax.f32 %v2471_v49, %v5747_v13  ;;  %v2612_v9 = vmul.f32 1.442695, %v2538_v26  ;;  %v2614_v40 = vmul.f32 1.442695, %v2539_v23 }
 0x484   : > { %4639 = vpow2.f32 %v2598_v47  ;;  %v2616_v60 = vmul.f32 1.442695, %v2540_v32  ;;  %v2618_v44 = vmul.f32 1.442695, %v2541_v16 }
 0x485   : > { %v5756_v6 = vpop.f32.mrb[92].mxu1  ;;  %4641 = vpow2.f32 %v2600_v10  ;;  %v2473_v56 = vmax.f32 %v2472_v57, %v5737_v28  ;;  %v2620_v57 = vmul.f32 1.442695, %v2542_v34 }
 0x486   : > { %v5758_v59 = vpop.f32.mrb[93].mxu1  ;;  %4643 = vpow2.f32 %v2602_v54 }
 0x487   : > { %v2474_v2 = vmax.f32 %v2473_v56, %v5753_v51  ;;  %4645 = vpow2.f32 %v2604_v62 }
 0x488   : > { %4647 = vpow2.f32 %v2606_v5 }
 0x489   : > { %v5761_v1 = vpop.f32.mrb[94].mxu1  ;;  %v2475_v25 = vmax.f32 %v2474_v2, %v5751_v52  ;;  %4649 = vpow2.f32 %v2608_v0  ;;  %v2622_v2 = vmul.f32 1.442695, %v2543_v37 }
 0x48a   : > { %v5764_v12 = vpop.f32.mrb[95].mxu1  ;;  %4651 = vpow2.f32 %v2610_v41 }
 0x48b   : > { %v5766_v22 = vpop.eup %4633  ;;  %v2476_v50 = vmax.f32 %v2475_v25, %v5758_v59  ;;  %4653 = vpow2.f32 %v2612_v9 }
 0x48c   : > { %v5768_v14 = vpop.eup %4635  ;;  %4655 = vpow2.f32 %v2614_v40 }
 0x48d   : > { %v2720_v30 = vadd.f32 %v5768_v14, %v5766_v22  ;;  %v5773_v35 = vpop.f32.mrb[96].mxu1  ;;  %v5775_v36 = vpop.eup %4637  ;;  %v2477_v38 = vmax.f32 %v2476_v50, %v5756_v6  ;;  %4657 = vpow2.f32 %v2616_v60 }
 0x48e   : > { %v5778_v24 = vpop.f32.mrb[97].mxu1  ;;  %v5783_v4 = vpop.eup %4639  ;;  %4659 = vpow2.f32 %v2618_v44 }
 0x48f   : > { %v2721_v53 = vadd.f32 %v5775_v36, %v2720_v30  ;;  %v2486_v3 = vmax.f32 %v5778_v24, %v5773_v35  ;;  %v5789_v11 = vpop.eup %4641  ;;  %v2478_v17 = vmax.f32 %v2477_v38, %v5764_v12  ;;  %4661 = vpow2.f32 %v2620_v57 }
 0x490   : > { %v5796_v19 = vpop.eup %4643  ;;  %4663 = vpow2.f32 %v2622_v2 }
 0x491   : > { %v2722_v27 = vadd.f32 %v5783_v4, %v2721_v53  ;;  %v5787_v31 = vpop.f32.mrb[98].mxu1  ;;  %v2479_v26 = vmax.f32 %v2478_v17, %v5761_v1  ;;  %v5803_v48 = vpop.eup %4645  ;;  %v2804_v53 = vsub.f32 0.0, %v5706_v8 }
 0x492   : > { %v5792_v46 = vpop.f32.mrb[99].mxu1  ;;  %v5812_v54 = vpop.eup %4647 }
 0x493   : > { %v2723_v43 = vadd.f32 %v5789_v11, %v2722_v27  ;;  %v2487_v55 = vmax.f32 %v2486_v3, %v5792_v46  ;;  %v2480_v47 = vrot.slane %v2479_v26, 4  ;;  %v5821_v16 = vpop.eup %4649 }
 0x494   : > { %v5830_v30 = vpop.eup %4651 }
 0x495   : > { %v2724_v39 = vadd.f32 %v5796_v19, %v2723_v43  ;;  %v5800_v42 = vpop.f32.mrb[100].mxu1  ;;  %v2488_v23 = vmax.f32 %v2487_v55, %v5787_v31  ;;  %v2481_v62 = vmax.f32 %v2479_v26, %v2480_v47  ;;  %v5837_v37 = vpop.eup %4653  ;;  %v2808_v55 = vmul.f32 1.442695, %v2804_v53 }
 0x496   : > { %v5808_v10 = vpop.f32.mrb[101].mxu1  ;;  %v5843_v17 = vpop.eup %4655 }
 0x497   : > { %v2725_v32 = vadd.f32 %v5803_v48, %v2724_v39  ;;  %v2489_v49 = vmax.f32 %v2488_v23, %v5808_v10  ;;  %v2482_v0 = vrot.slane %v2481_v62, 2  ;;  %v5851_v39 = vpop.eup %4657  ;;  %4665 = vpow2.f32 %v2808_v55 }
 0x499   : > { %v2726_v56 = vadd.f32 %v5812_v54, %v2725_v32  ;;  %v5818_v5 = vpop.f32.mrb[102].mxu1  ;;  %v2490_v7 = vmax.f32 %v2489_v49, %v5800_v42  ;;  %v2483_v41 = vmax.f32 %v2481_v62, %v2482_v0 }
 0x49a   : > { %v5826_v25 = vpop.f32.mrb[103].mxu1 }
 0x49b   : > { %v2727_v21 = vadd.f32 %v5821_v16, %v2726_v56  ;;  %v2491_v34 = vmax.f32 %v2490_v7, %v5826_v25  ;;  %v2484_v9 = vrot.slane %v2483_v41, 1 }
 0x49d   : > { %v2728_v50 = vadd.f32 %v5830_v30, %v2727_v21  ;;  %v5834_v3 = vpop.f32.mrb[104].mxu1  ;;  %v2492_v18 = vmax.f32 %v2491_v34, %v5818_v5  ;;  %v5845_v43 = vmax.f32 %v2483_v41, %v2484_v9 }
 0x49e   : > { %v5839_v38 = vpop.f32.mrb[105].mxu1 }
 0x49f   : > { %v2729_v27 = vadd.f32 %v5837_v37, %v2728_v50  ;;  %v2493_v40 = vmax.f32 %v2492_v18, %v5839_v38  ;;  %v2544_v23 = vsub.f32 %v5691_v33, %v5845_v43  ;;  %v2545_v44 = vsub.f32 %v5689_v29, %v5845_v43  ;;  %v5870_v29 = vpop.eup %4659 }
 0x4a0   : > { %v2546_v47 = vsub.f32 %v5697_v45, %v5845_v43  ;;  %v2547_v32 = vsub.f32 %v5695_v63, %v5845_v43  ;;  %v2548_v62 = vsub.f32 %v5703_v61, %v5845_v43  ;;  %v2549_v56 = vsub.f32 %v5700_v58, %v5845_v43 }
 0x4a1   : > { %v2730_v8 = vadd.f32 %v5843_v17, %v2729_v27  ;;  %v5848_v60 = vpop.f32.mrb[106].mxu1  ;;  %v2494_v26 = vmax.f32 %v2493_v40, %v5834_v3  ;;  %v2550_v33 = vsub.f32 %v5711_v20, %v5845_v43  ;;  %v2551_v45 = vsub.f32 %v5708_v15, %v5845_v43 }
 0x4a2   : > { %v5861_v49 = vpop.f32.mrb[107].mxu1  ;;  %v2552_v63 = vsub.f32 %v5747_v13, %v5845_v43  ;;  %v5889_v13 = vpop.eup %4661  ;;  %v2624_v41 = vmul.f32 1.442695, %v2544_v23  ;;  %v2626_v50 = vmul.f32 1.442695, %v2545_v44 }
 0x4a3   : > { %v2731_v57 = vadd.f32 %v5851_v39, %v2730_v8  ;;  %v2628_v9 = vmul.f32 1.442695, %v2546_v47  ;;  %v5898_v27 = vpop.eup %4663  ;;  %v2630_v8 = vmul.f32 1.442695, %v2547_v32  ;;  %v2632_v34 = vmul.f32 1.442695, %v2548_v62 }
 0x4a4   : > { %4667 = vpow2.f32 %v2624_v41  ;;  %v2495_v44 = vmax.f32 %v2494_v26, %v5861_v49  ;;  %v2634_v55 = vmul.f32 1.442695, %v2549_v56  ;;  %v2636_v32 = vmul.f32 1.442695, %v2550_v33 }
 0x4a5   : > { %v2732_v2 = vadd.f32 %v5870_v29, %v2731_v57  ;;  %v5887_v0 = vpop.f32.mrb[108].mxu1  ;;  %4669 = vpow2.f32 %v2626_v50  ;;  %v2638_v26 = vmul.f32 1.442695, %v2551_v45 }
 0x4a6   : > { %v5895_v53 = vpop.f32.mrb[109].mxu1  ;;  %4671 = vpow2.f32 %v2628_v9  ;;  %v4666_v9 = vpop.eup %4665 }
 0x4a7   : > { %v2733_v18 = vadd.f32 %v5889_v13, %v2732_v2  ;;  %4673 = vpow2.f32 %v2630_v8  ;;  %v2496_v2 = vmax.f32 %v2495_v44, %v5848_v60 }
 0x4a8   : > { %4675 = vpow2.f32 %v2632_v34  ;;  %v2640_v34 = vmul.f32 1.442695, %v2552_v63 }
 0x4a9   : > { %v2734_v40 = vadd.f32 %v5898_v27, %v2733_v18  ;;  %v5901_v57 = vpop.f32.mrb[110].mxu1  ;;  %v2497_v62 = vmax.f32 %v2496_v2, %v5895_v53  ;;  %4677 = vpow2.f32 %v2634_v55 }
 0x4aa   : > { %v5903_v23 = vpop.f32.mrb[111].mxu1  ;;  %4679 = vpow2.f32 %v2636_v32 }
 0x4ab   : > { %v2735_v21 = vrot.slane %v2734_v40, 4  ;;  %4681 = vpow2.f32 %v2638_v26 }
 0x4ac   : > { %4683 = vpow2.f32 %v2640_v34 }
 0x4ad   : > { %v2736_v15 = vadd.f32 %v2735_v21, %v2734_v40  ;;  %v5906_v47 = vpop.f32.mrb[112].mxu1  ;;  %v2498_v40 = vmax.f32 %v2497_v62, %v5887_v0 }
 0x4ae   : > { %v5909_v41 = vpop.f32.mrb[113].mxu1  ;;  %v5916_v56 = vpop.eup %4667 }
 0x4af   : > { %v2737_v50 = vrot.slane %v2736_v15, 2  ;;  %v2507_v18 = vmax.f32 %v5909_v41, %v5906_v47  ;;  %6490 = vst [vmem:[#allocation16_spill] sm:$0xff] %v5916_v56  ;;  %v5921_v44 = vpop.eup %4669  ;;  %v2499_v45 = vmax.f32 %v2498_v40, %v5903_v23 }
 0x4b0   : > { %6491 = vst [vmem:[#allocation17_spill] sm:$0xff] %v5921_v44  ;;  %v5927_v55 = vpop.eup %4671 }
 0x4b1   : > { %v2738_v20 = vadd.f32 %v2737_v50, %v2736_v15  ;;  %v5914_v21 = vpop.f32.mrb[114].mxu1  ;;  %v2741_v15 = vadd.f32 %v5921_v44, %v5916_v56  ;;  %6492 = vst [vmem:[#allocation18_spill] sm:$0xff] %v5927_v55  ;;  %v2816_v50 = vmul.f32 12.0, %v4666_v9  ;;  %v2500_v63 = vmax.f32 %v2499_v45, %v5901_v57 }
 0x4b2   : > { %v5919_v8 = vpop.f32.mrb[115].mxu1 }
 0x4b3   : > { %v2739_v33 = vrot.slane %v2738_v20, 1  ;;  %v2508_v58 = vmax.f32 %v2507_v18, %v5919_v8  ;;  %v2742_v7 = vadd.f32 %v5927_v55, %v2741_v15  ;;  %v5936_v18 = vpop.eup %4673  ;;  %v2501_v9 = vrot.slane %v2500_v63, 4 }
 0x4b4   : > { %6493 = vst [vmem:[#allocation19_spill] sm:$0xff] %v5936_v18  ;;  %v5940_v26 = vpop.eup %4675 }
 0x4b5   : > { %v2740_v2 = vadd.f32 %v2739_v33, %v2738_v20  ;;  %v5929_v62 = vpop.f32.mrb[116].mxu1  ;;  %v2509_v61 = vmax.f32 %v2508_v58, %v5914_v21  ;;  %v2743_v20 = vadd.f32 %v5936_v18, %v2742_v7  ;;  %v6494_v58 = vsub.f32 %v5737_v28, %v5845_v43  ;;  %v5954_v18 = vpop.eup %4677 }
 0x4b6   : > { %v5934_v32 = vpop.f32.mrb[117].mxu1  ;;  %6496 = vst [vmem:[#allocation20_spill] sm:$0xff] %v5954_v18  ;;  %v5964_v56 = vpop.eup %4679 }
 0x4b7   : > { %v2820_v44 = vsub.f32 %v2740_v2, %v2816_v50  ;;  %v2510_v40 = vmax.f32 %v2509_v61, %v5934_v32  ;;  %v2642_v33 = vmul.f32 1.442695, %v6494_v58  ;;  %v6495_v2 = vsub.f32 %v5753_v51, %v5845_v43 }
 0x4b8   : > { %v2744_v61 = vadd.f32 %v5940_v26, %v2743_v20  ;;  %v2502_v50 = vmax.f32 %v2500_v63, %v2501_v9  ;;  %v6499_v63 = vsub.f32 %v5756_v6, %v5845_v43  ;;  %v6501_v6 = vsub.f32 %v5761_v1, %v5845_v43 }
 0x4b9   : > { %4685 = vrcp.f32 %v2820_v44  ;;  %v5945_v15 = vpop.f32.mrb[118].mxu1  ;;  %v2511_v45 = vmax.f32 %v2510_v40, %v5929_v62  ;;  %v2644_v34 = vmul.f32 1.442695, %v6495_v2  ;;  %v6497_v44 = vsub.f32 %v5751_v52, %v5845_v43 }
 0x4ba   : > { %v5952_v7 = vpop.f32.mrb[119].mxu1  ;;  %v6498_v40 = vsub.f32 %v5758_v59, %v5845_v43  ;;  %v2745_v51 = vadd.f32 %v5954_v18, %v2744_v61  ;;  %v2503_v2 = vrot.slane %v2502_v50, 2  ;;  %4687 = vpow2.f32 %v2642_v33  ;;  %v5978_v18 = vpop.eup %4681 }
 0x4bb   : > { %v2646_v28 = vmul.f32 1.442695, %v6497_v44  ;;  %v2512_v58 = vmax.f32 %v2511_v45, %v5952_v7  ;;  %v2650_v20 = vmul.f32 1.442695, %v6499_v63  ;;  %4689 = vpow2.f32 %v2644_v34 }
 0x4bc   : > { %v2648_v55 = vmul.f32 1.442695, %v6498_v40  ;;  %v6500_v45 = vsub.f32 %v5764_v12, %v5845_v43  ;;  %v2746_v44 = vadd.f32 %v5964_v56, %v2745_v51  ;;  %v2504_v61 = vmax.f32 %v2502_v50, %v2503_v2  ;;  %v5985_v12 = vpop.eup %4683 }
 0x4bd   : > { %v5969_v9 = vpop.f32.mrb[120].mxu1  ;;  %v2513_v52 = vmax.f32 %v2512_v58, %v5945_v15  ;;  %4691 = vpow2.f32 %v2646_v28  ;;  %v2654_v33 = vmul.f32 1.442695, %v6501_v6 }
 0x4be   : > { %v2652_v59 = vmul.f32 1.442695, %v6500_v45  ;;  %v5976_v40 = vpop.f32.mrb[121].mxu1  ;;  %4693 = vpow2.f32 %v2648_v55  ;;  %v2747_v34 = vadd.f32 %v5978_v18, %v2746_v44  ;;  %v2505_v58 = vrot.slane %v2504_v61, 1 }
 0x4bf   : > { %v2514_v63 = vmax.f32 %v2513_v52, %v5976_v40  ;;  %4695 = vpow2.f32 %v2650_v20  ;;  %v2805_v52 = vsub.f32 0.0, %v5845_v43 }
 0x4c0   : > { %4697 = vpow2.f32 %v2652_v59  ;;  %v2748_v28 = vadd.f32 %v5985_v12, %v2747_v34  ;;  %v5994_v55 = vmax.f32 %v2504_v61, %v2505_v58 }
 0x4c1   : > { %v5987_v51 = vpop.f32.mrb[122].mxu1  ;;  %v2515_v50 = vmax.f32 %v2514_v63, %v5969_v9  ;;  %4699 = vpow2.f32 %v2654_v33 }
 0x4c2   : > { %v5991_v2 = vpop.f32.mrb[123].mxu1 }
 0x4c3   : > { %v4686_v1 = vpop.eup %4685  ;;  %v5997_v45 = vmax.f32 %v2515_v50, %v5991_v2 }
 0x4c4   : > { %v2825_v20 = vmul.f32 %v4686_v1, %v5766_v22  ;;  %v2826_v44 = vmul.f32 %v4686_v1, %v5768_v14  ;;  %v2827_v59 = vmul.f32 %v4686_v1, %v5775_v36  ;;  %v2828_v6 = vmul.f32 %v4686_v1, %v5783_v4 }
 0x4c5   : > { %v2829_v63 = vmul.f32 %v4686_v1, %v5789_v11  ;;  %v2830_v33 = vmul.f32 %v4686_v1, %v5796_v19  ;;  %v2831_v34 = vmul.f32 %v4686_v1, %v5803_v48  ;;  %v2832_v61 = vmul.f32 %v4686_v1, %v5812_v54  ;;  %v6007_v58 = vpop.f32.mrb[124].mxu1  ;;  %v6022_v11 = vpop.eup %4687 }
 0x4c6   : > { %v2833_v50 = vmul.f32 %v4686_v1, %v5821_v16  ;;  %v2834_v22 = vmul.f32 %v4686_v1, %v5830_v30  ;;  %v2835_v14 = vmul.f32 %v4686_v1, %v5837_v37  ;;  %v2836_v36 = vmul.f32 %v4686_v1, %v5843_v17  ;;  %2892 = vst [vmem:[%s6014_s21] sm:$0xff] %v2825_v20  ;;  %v6020_v4 = vpop.f32.mrb[125].mxu1  ;;  %v6032_v30 = vpop.eup %4689 }
 0x4c7   : > { %2893 = vst [vmem:[%s6014_s21 + $0x8] sm:$0xff] %v2826_v44  ;;  %2894 = vst [vmem:[%s6014_s21 + $0x10] sm:$0xff] %v2827_v59  ;;  %v2837_v19 = vmul.f32 %v4686_v1, %v5851_v39  ;;  %v2838_v48 = vmul.f32 %v4686_v1, %v5870_v29  ;;  %v2839_v54 = vmul.f32 %v4686_v1, %v5889_v13  ;;  %v6045_v13 = vpop.eup %4691 }
 0x4c8   : > { %2895 = vst [vmem:[%s6014_s21 + $0x18] sm:$0xff] %v2828_v6  ;;  %v2840_v16 = vmul.f32 %v4686_v1, %v5898_v27  ;;  %2896 = vst [vmem:[%s6014_s21 + $0x20] sm:$0xff] %v2829_v63  ;;  %v2749_v37 = vadd.f32 %v6022_v11, %v2748_v28  ;;  %v2560_v17 = vsub.f32 %v5778_v24, %v5994_v55 }
 0x4c9   : > { %2897 = vst [vmem:[%s6014_s21 + $0x28] sm:$0xff] %v2830_v33  ;;  %2898 = vst [vmem:[%s6014_s21 + $0x30] sm:$0xff] %v2831_v34  ;;  %v2561_v39 = vsub.f32 %v5773_v35, %v5994_v55  ;;  %v2562_v29 = vsub.f32 %v5792_v46, %v5994_v55  ;;  %v2563_v27 = vsub.f32 %v5787_v31, %v5994_v55  ;;  %v6059_v1 = vpop.f32.mrb[126].mxu1  ;;  %v6061_v46 = vpop.eup %4693 }
 0x4ca   : > { %2899 = vst [vmem:[%s6014_s21 + $0x38] sm:$0xff] %v2832_v61  ;;  %2900 = vst [vmem:[%s6014_s21 + $0x40] sm:$0xff] %v2833_v50  ;;  %v2564_v28 = vsub.f32 %v5808_v10, %v5994_v55  ;;  %v2565_v24 = vsub.f32 %v5800_v42, %v5994_v55  ;;  %v2566_v35 = vsub.f32 %v5826_v25, %v5994_v55  ;;  %v6070_v59 = vpop.f32.mrb[127].mxu1  ;;  %v6072_v42 = vpop.eup %4695 }
 0x4cb   : > { %2901 = vst [vmem:[%s6014_s21 + $0x48] sm:$0xff] %v2834_v22  ;;  %2902 = vst [vmem:[%s6014_s21 + $0x50] sm:$0xff] %v2835_v14  ;;  %v2750_v20 = vadd.f32 %v6032_v30, %v2749_v37  ;;  %v2567_v44 = vsub.f32 %v5818_v5, %v5994_v55  ;;  %v2568_v31 = vsub.f32 %v5839_v38, %v5994_v55  ;;  %v6082_v38 = vpop.eup %4697  ;;  %v2660_v50 = vmul.f32 1.442695, %v2562_v29 }
 0x4cc   : > { %2903 = vst [vmem:[%s6014_s21 + $0x58] sm:$0xff] %v2836_v36  ;;  %2904 = vst [vmem:[%s6014_s21 + $0x60] sm:$0xff] %v2837_v19  ;;  %v2569_v10 = vsub.f32 %v5834_v3, %v5994_v55  ;;  %v2570_v25 = vsub.f32 %v5861_v49, %v5994_v55  ;;  %v2571_v6 = vsub.f32 %v5848_v60, %v5994_v55  ;;  %v2656_v49 = vmul.f32 1.442695, %v2560_v17  ;;  %v6089_v61 = vpop.eup %4699 }
 0x4cd   : > { %2905 = vst [vmem:[%s6014_s21 + $0x68] sm:$0xff] %v2838_v48  ;;  %2906 = vst [vmem:[%s6014_s21 + $0x70] sm:$0xff] %v2839_v54  ;;  %v2572_v63 = vsub.f32 %v5895_v53, %v5994_v55  ;;  %v2573_v5 = vsub.f32 %v5887_v0, %v5994_v55  ;;  %v2751_v3 = vadd.f32 %v6045_v13, %v2750_v20  ;;  %v2658_v60 = vmul.f32 1.442695, %v2561_v39 }
 0x4ce   : > { %2907 = vst [vmem:[%s6014_s21 + $0x78] sm:$0xff] %v2840_v16  ;;  %v2574_v33 = vsub.f32 %v5903_v23, %v5994_v55  ;;  %v2575_v34 = vsub.f32 %v5901_v57, %v5994_v55  ;;  %v2517_v53 = vmax.f32 %v5997_v45, %v5987_v51  ;;  %v2810_v14 = vmul.f32 1.442695, %v2805_v52 }
 0x4cf   : > { %v2752_v22 = vadd.f32 %v6061_v46, %v2751_v3  ;;  %4701 = vpow2.f32 %v2656_v49  ;;  %v2662_v36 = vmul.f32 1.442695, %v2563_v27  ;;  %v2664_v48 = vmul.f32 1.442695, %v2564_v28 }
 0x4d0   : > { %4703 = vpow2.f32 %v2658_v60  ;;  %v2666_v16 = vmul.f32 1.442695, %v2565_v24  ;;  %v2518_v37 = vmax.f32 %v2517_v53, %v6020_v4  ;;  %v2668_v17 = vmul.f32 1.442695, %v2566_v35 }
 0x4d1   : > { %v2753_v19 = vadd.f32 %v6072_v42, %v2752_v22  ;;  %4705 = vpow2.f32 %v2660_v50  ;;  %v2670_v39 = vmul.f32 1.442695, %v2567_v44  ;;  %v2672_v24 = vmul.f32 1.442695, %v2568_v31 }
 0x4d2   : > { %4707 = vpow2.f32 %v2810_v14  ;;  %v2519_v43 = vmax.f32 %v2518_v37, %v6007_v58  ;;  %v2674_v50 = vmul.f32 1.442695, %v2569_v10  ;;  %v2678_v37 = vmul.f32 1.442695, %v2571_v6 }
 0x4d3   : > { %v2754_v54 = vadd.f32 %v6082_v38, %v2753_v19  ;;  %4709 = vpow2.f32 %v2662_v36  ;;  %v2676_v19 = vmul.f32 1.442695, %v2570_v25  ;;  %v2682_v25 = vmul.f32 1.442695, %v2573_v5 }
 0x4d4   : > { %4711 = vpow2.f32 %v2664_v48  ;;  %v2520_v29 = vmax.f32 %v2519_v43, %v6070_v59  ;;  %v2686_v0 = vmul.f32 1.442695, %v2575_v34 }
 0x4d5   : > { %v2755_v45 = vadd.f32 %v6089_v61, %v2754_v54  ;;  %4713 = vpow2.f32 %v2666_v16 }
 0x4d6   : > { %4715 = vpow2.f32 %v2668_v17  ;;  %v2521_v3 = vmax.f32 %v2520_v29, %v6059_v1 }
 0x4d7   : > { %v2756_v52 = vrot.slane %v2755_v45, 4  ;;  %4717 = vpow2.f32 %v2670_v39  ;;  %v2680_v39 = vmul.f32 1.442695, %v2572_v63  ;;  %v2684_v63 = vmul.f32 1.442695, %v2574_v33 }
 0x4d8   : > { %v2522_v44 = vrot.slane %v2521_v3, 4  ;;  %4719 = vpow2.f32 %v2672_v24 }
 0x4d9   : > { %v6102_v27 = vpop.eup %4701  ;;  %v2757_v28 = vadd.f32 %v2756_v52, %v2755_v45  ;;  %4721 = vpow2.f32 %v2674_v50 }
 0x4da   : > { %v6104_v20 = vpop.eup %4703  ;;  %v2523_v31 = vmax.f32 %v2521_v3, %v2522_v44  ;;  %4723 = vpow2.f32 %v2676_v19 }
 0x4db   : > { %v2758_v49 = vrot.slane %v2757_v28, 2  ;;  %v2762_v35 = vadd.f32 %v6104_v20, %v6102_v27  ;;  %v6109_v60 = vpop.eup %4705  ;;  %4725 = vpow2.f32 %v2678_v37 }
 0x4dc   : > { %v4708_v53 = vpop.eup %4707  ;;  %v2524_v45 = vrot.slane %v2523_v31, 2 }
 0x4dd   : > { %v2759_v22 = vadd.f32 %v2758_v49, %v2757_v28  ;;  %v2763_v14 = vadd.f32 %v6109_v60, %v2762_v35  ;;  %v6112_v36 = vpop.eup %4709  ;;  %v2817_v10 = vmul.f32 12.0, %v4708_v53 }
 0x4de   : > { %v6115_v16 = vpop.eup %4711  ;;  %v2525_v29 = vmax.f32 %v2523_v31, %v2524_v45 }
 0x4df   : > { %v2760_v48 = vrot.slane %v2759_v22, 1  ;;  %v2764_v54 = vadd.f32 %v6112_v36, %v2763_v14  ;;  %v6118_v52 = vpop.eup %4713 }
 0x4e0   : > { %v6124_v3 = vpop.eup %4715  ;;  %v2526_v6 = vrot.slane %v2525_v29, 1 }
 0x4e1   : > { %v2761_v17 = vadd.f32 %v2760_v48, %v2759_v22  ;;  %v2765_v43 = vadd.f32 %v6115_v16, %v2764_v54  ;;  %v6127_v35 = vpop.eup %4717 }
 0x4e2   : > { %v6132_v50 = vmax.f32 %v2525_v29, %v2526_v6  ;;  %v6138_v44 = vpop.eup %4719 }
 0x4e3   : > { %v2821_v28 = vsub.f32 %v2761_v17, %v2817_v10  ;;  %v2766_v24 = vadd.f32 %v6118_v52, %v2765_v43  ;;  %v6155_v19 = vpop.eup %4721 }
 0x4e4   : > { %v2576_v53 = vsub.f32 %v5909_v41, %v6132_v50  ;;  %v2577_v22 = vsub.f32 %v5906_v47, %v6132_v50  ;;  %v2578_v23 = vsub.f32 %v5919_v8, %v6132_v50  ;;  %v2579_v33 = vsub.f32 %v5914_v21, %v6132_v50  ;;  %v6170_v37 = vpop.eup %4723 }
 0x4e5   : > { %4727 = vrcp.f32 %v2821_v28  ;;  %v2767_v49 = vadd.f32 %v6124_v3, %v2766_v24  ;;  %v2580_v57 = vsub.f32 %v5934_v32, %v6132_v50  ;;  %v2581_v34 = vsub.f32 %v5929_v62, %v6132_v50  ;;  %v6179_v28 = vpop.eup %4725 }
 0x4e6   : > { %4729 = vpow2.f32 %v2680_v39  ;;  %v2582_v41 = vsub.f32 %v5952_v7, %v6132_v50  ;;  %v2583_v47 = vsub.f32 %v5945_v15, %v6132_v50  ;;  %v2584_v21 = vsub.f32 %v5976_v40, %v6132_v50 }
 0x4e7   : > { %4731 = vpow2.f32 %v2682_v25  ;;  %v2768_v5 = vadd.f32 %v6127_v35, %v2767_v49  ;;  %v2585_v8 = vsub.f32 %v5969_v9, %v6132_v50  ;;  %v2586_v31 = vsub.f32 %v5991_v2, %v6132_v50 }
 0x4e8   : > { %4733 = vpow2.f32 %v2684_v63  ;;  %v2587_v48 = vsub.f32 %v5987_v51, %v6132_v50  ;;  %v2588_v54 = vsub.f32 %v6020_v4, %v6132_v50  ;;  %v2589_v45 = vsub.f32 %v6007_v58, %v6132_v50 }
 0x4e9   : > { %v2769_v14 = vadd.f32 %v6138_v44, %v2768_v5  ;;  %v2688_v43 = vmul.f32 1.442695, %v2576_v53  ;;  %4735 = vpow2.f32 %v2686_v0  ;;  %v2690_v29 = vmul.f32 1.442695, %v2577_v22  ;;  %v6502_v53 = vld [vmem:[#allocation16_spill] sm:$0xff] }
 0x4ea   : > { %v2806_v25 = vsub.f32 0.0, %v5994_v55  ;;  %v2692_v49 = vmul.f32 1.442695, %v2578_v23  ;;  %v2694_v63 = vmul.f32 1.442695, %v2579_v33  ;;  %v6505_v55 = vld [vmem:[#allocation19_spill] sm:$0xff] }
 0x4eb   : > { %v2770_v32 = vadd.f32 %v6155_v19, %v2769_v14  ;;  %4737 = vpow2.f32 %v2688_v43  ;;  %v6503_v14 = vld [vmem:[#allocation17_spill] sm:$0xff]  ;;  %v6506_v23 = vld [vmem:[#allocation20_spill] sm:$0xff]  ;;  %v2702_v62 = vmul.f32 1.442695, %v2583_v47  ;;  %v2704_v7 = vmul.f32 1.442695, %v2584_v21 }
 0x4ec   : > { %4739 = vpow2.f32 %v2690_v29  ;;  %v2710_v9 = vmul.f32 1.442695, %v2587_v48  ;;  %v2712_v2 = vmul.f32 1.442695, %v2588_v54  ;;  %v2714_v4 = vmul.f32 1.442695, %v2589_v45 }
 0x4ed   : > { %v2771_v39 = vadd.f32 %v6170_v37, %v2770_v32  ;;  %v6504_v32 = vld [vmem:[#allocation18_spill] sm:$0xff]  ;;  %4741 = vpow2.f32 %v2692_v49 }
 0x4ee   : > { %4743 = vpow2.f32 %v2694_v63 }
 0x4ef   : > { %v4728_v24 = vpop.eup %4727  ;;  %v2772_v6 = vadd.f32 %v6179_v28, %v2771_v39 }
 0x4f0   : > { %v6183_v5 = vpop.eup %4729  ;;  %v2842_v0 = vmul.f32 %v4728_v24, %v6502_v53  ;;  %v2843_v22 = vmul.f32 %v4728_v24, %v6503_v14  ;;  %v2844_v10 = vmul.f32 %v4728_v24, %v6504_v32  ;;  %v2845_v43 = vmul.f32 %v4728_v24, %v6505_v55 }
 0x4f1   : > { %v6189_v17 = vpop.eup %4731  ;;  %v2846_v39 = vmul.f32 %v4728_v24, %v5940_v26  ;;  %v2847_v33 = vmul.f32 %v4728_v24, %v6506_v23  ;;  %v2848_v29 = vmul.f32 %v4728_v24, %v5964_v56  ;;  %v2849_v53 = vmul.f32 %v4728_v24, %v5978_v18 }
 0x4f2   : > { %v2850_v14 = vmul.f32 %v4728_v24, %v5985_v12  ;;  %v2851_v32 = vmul.f32 %v4728_v24, %v6022_v11  ;;  %v2852_v55 = vmul.f32 %v4728_v24, %v6032_v30  ;;  %v2853_v26 = vmul.f32 %v4728_v24, %v6045_v13  ;;  %2908 = vst [vmem:[%s6014_s21 + $0x80] sm:$0xff] %v2842_v0  ;;  %v6211_v30 = vpop.eup %4733 }
 0x4f3   : > { %2909 = vst [vmem:[%s6014_s21 + $0x88] sm:$0xff] %v2843_v22  ;;  %2910 = vst [vmem:[%s6014_s21 + $0x90] sm:$0xff] %v2844_v10  ;;  %v2854_v56 = vmul.f32 %v4728_v24, %v6061_v46  ;;  %v2855_v18 = vmul.f32 %v4728_v24, %v6072_v42  ;;  %v2856_v12 = vmul.f32 %v4728_v24, %v6082_v38  ;;  %v2696_v46 = vmul.f32 1.442695, %v2580_v57  ;;  %v6226_v10 = vpop.eup %4735 }
 0x4f4   : > { %2911 = vst [vmem:[%s6014_s21 + $0x98] sm:$0xff] %v2845_v43  ;;  %v2857_v11 = vmul.f32 %v4728_v24, %v6089_v61  ;;  %2912 = vst [vmem:[%s6014_s21 + $0xa0] sm:$0xff] %v2846_v39  ;;  %v2773_v13 = vadd.f32 %v6183_v5, %v2772_v6  ;;  %v2812_v42 = vmul.f32 1.442695, %v2806_v25  ;;  %v2698_v61 = vmul.f32 1.442695, %v2581_v34 }
 0x4f5   : > { %2913 = vst [vmem:[%s6014_s21 + $0xa8] sm:$0xff] %v2847_v33  ;;  %2914 = vst [vmem:[%s6014_s21 + $0xb0] sm:$0xff] %v2848_v29  ;;  %v6228_v24 = vpop.eup %4737  ;;  %4745 = vpow2.f32 %v2696_v46  ;;  %v2700_v57 = vmul.f32 1.442695, %v2582_v41  ;;  %v2706_v22 = vmul.f32 1.442695, %v2585_v8 }
 0x4f6   : > { %2915 = vst [vmem:[%s6014_s21 + $0xb8] sm:$0xff] %v2849_v53  ;;  %2916 = vst [vmem:[%s6014_s21 + $0xc0] sm:$0xff] %v2850_v14  ;;  %v2774_v38 = vadd.f32 %v6189_v17, %v2773_v13  ;;  %v6234_v49 = vpop.eup %4739  ;;  %4747 = vpow2.f32 %v2812_v42  ;;  %v2708_v39 = vmul.f32 1.442695, %v2586_v31 }
 0x4f7   : > { %2917 = vst [vmem:[%s6014_s21 + $0xc8] sm:$0xff] %v2851_v32  ;;  %2918 = vst [vmem:[%s6014_s21 + $0xd0] sm:$0xff] %v2852_v55  ;;  %4749 = vpow2.f32 %v2698_v61  ;;  %v2783_v34 = vadd.f32 %v6234_v49, %v6228_v24  ;;  %v6245_v41 = vpop.eup %4741 }
 0x4f8   : > { %2919 = vst [vmem:[%s6014_s21 + $0xd8] sm:$0xff] %v2853_v26  ;;  %2920 = vst [vmem:[%s6014_s21 + $0xe0] sm:$0xff] %v2854_v56  ;;  %v2775_v6 = vadd.f32 %v6211_v30, %v2774_v38  ;;  %4751 = vpow2.f32 %v2700_v57  ;;  %v6251_v47 = vpop.eup %4743  ;;  %v6508_v38 = vsub.f32 %v6059_v1, %v6132_v50 }
 0x4f9   : > { %2921 = vst [vmem:[%s6014_s21 + $0xe8] sm:$0xff] %v2855_v18  ;;  %2922 = vst [vmem:[%s6014_s21 + $0xf0] sm:$0xff] %v2856_v12  ;;  %4753 = vpow2.f32 %v2702_v62  ;;  %v2784_v15 = vadd.f32 %v6245_v41, %v2783_v34 }
 0x4fa   : > { %2923 = vst [vmem:[%s6014_s21 + $0xf8] sm:$0xff] %v2857_v11  ;;  %v2776_v25 = vadd.f32 %v6226_v10, %v2775_v6  ;;  %4755 = vpow2.f32 %v2704_v7  ;;  %v6507_v11 = vsub.f32 %v6070_v59, %v6132_v50  ;;  %v2718_v61 = vmul.f32 1.442695, %v6508_v38 }
 0x4fb   : > { %v2785_v40 = vadd.f32 %v6251_v47, %v2784_v15  ;;  %4757 = vpow2.f32 %v2706_v22  ;;  %v2807_v6 = vsub.f32 0.0, %v6132_v50 }
 0x4fc   : > { %v2777_v63 = vrot.slane %v2776_v25, 4  ;;  %4759 = vpow2.f32 %v2708_v39  ;;  %v2716_v13 = vmul.f32 1.442695, %v6507_v11 }
 0x4fd   : > { %4761 = vpow2.f32 %v2710_v9  ;;  %v2814_v1 = vmul.f32 1.442695, %v2807_v6 }
 0x4fe   : > { %v2778_v0 = vadd.f32 %v2777_v63, %v2776_v25  ;;  %4763 = vpow2.f32 %v2712_v2 }
 0x4ff   : > { %v6257_v21 = vpop.eup %4745 }
 0x500   : > { %v2779_v43 = vrot.slane %v2778_v0, 2  ;;  %v4748_v8 = vpop.eup %4747  ;;  %v2786_v33 = vadd.f32 %v6257_v21, %v2785_v40 }
 0x501   : > { %v6263_v29 = vpop.eup %4749  ;;  %v2818_v55 = vmul.f32 12.0, %v4748_v8 }
 0x502   : > { %v2780_v23 = vadd.f32 %v2779_v43, %v2778_v0  ;;  %v2787_v31 = vadd.f32 %v6263_v29, %v2786_v33  ;;  %v6269_v14 = vpop.eup %4751 }
 0x503   : > { %v6272_v48 = vpop.eup %4753 }
 0x504   : > { %v2781_v53 = vrot.slane %v2780_v23, 1  ;;  %v2788_v51 = vadd.f32 %v6269_v14, %v2787_v31  ;;  %v6275_v18 = vpop.eup %4755 }
 0x505   : > { %v6281_v12 = vpop.eup %4757 }
 0x506   : > { %v2782_v32 = vadd.f32 %v2781_v53, %v2780_v23  ;;  %v2789_v56 = vadd.f32 %v6272_v48, %v2788_v51  ;;  %v6287_v42 = vpop.eup %4759 }
 0x507   : > { %v6293_v45 = vpop.eup %4761 }
 0x508   : > { %v2822_v26 = vsub.f32 %v2782_v32, %v2818_v55  ;;  %v2790_v54 = vadd.f32 %v6275_v18, %v2789_v56  ;;  %v6297_v59 = vpop.eup %4763 }
 0x50a   : > { %4765 = vrcp.f32 %v2822_v26  ;;  %v2791_v46 = vadd.f32 %v6281_v12, %v2790_v54 }
 0x50b   : > { %4767 = vpow2.f32 %v2714_v4 }
 0x50c   : > { %v2792_v58 = vadd.f32 %v6287_v42, %v2791_v46  ;;  %4769 = vpow2.f32 %v2716_v13 }
 0x50d   : > { %4771 = vpow2.f32 %v2718_v61 }
 0x50e   : > { %v2793_v57 = vadd.f32 %v6293_v45, %v2792_v58  ;;  %4773 = vpow2.f32 %v2814_v1 }
 0x510   : > { %v2794_v25 = vadd.f32 %v6297_v59, %v2793_v57 }
 0x514   : > { %v4766_v62 = vpop.eup %4765 }
 0x515   : > { %v2859_v34 = vmul.f32 %v4766_v62, %v6102_v27  ;;  %v2860_v63 = vmul.f32 %v4766_v62, %v6104_v20  ;;  %v2861_v7 = vmul.f32 %v4766_v62, %v6109_v60  ;;  %v2862_v50 = vmul.f32 %v4766_v62, %v6112_v36  ;;  %v4768_v36 = vpop.eup %4767 }
 0x516   : > { %v2863_v0 = vmul.f32 %v4766_v62, %v6115_v16  ;;  %v2864_v22 = vmul.f32 %v4766_v62, %v6118_v52  ;;  %v2865_v15 = vmul.f32 %v4766_v62, %v6124_v3  ;;  %v2866_v43 = vmul.f32 %v4766_v62, %v6127_v35 }
 0x517   : > { %v2867_v39 = vmul.f32 %v4766_v62, %v6138_v44  ;;  %v2868_v27 = vmul.f32 %v4766_v62, %v6155_v19  ;;  %v2869_v20 = vmul.f32 %v4766_v62, %v6170_v37  ;;  %v2870_v60 = vmul.f32 %v4766_v62, %v6179_v28  ;;  %2924 = vst [vmem:[%s6014_s21 + $0x100] sm:$0xff] %v2859_v34  ;;  %v4770_v19 = vpop.eup %4769 }
 0x518   : > { %2925 = vst [vmem:[%s6014_s21 + $0x108] sm:$0xff] %v2860_v63  ;;  %2926 = vst [vmem:[%s6014_s21 + $0x110] sm:$0xff] %v2861_v7  ;;  %v2871_v16 = vmul.f32 %v4766_v62, %v6183_v5  ;;  %v2872_v52 = vmul.f32 %v4766_v62, %v6189_v17  ;;  %v2873_v3 = vmul.f32 %v4766_v62, %v6211_v30  ;;  %v4772_v17 = vpop.eup %4771 }
 0x519   : > { %2927 = vst [vmem:[%s6014_s21 + $0x118] sm:$0xff] %v2862_v50  ;;  %v2874_v35 = vmul.f32 %v4766_v62, %v6226_v10  ;;  %2928 = vst [vmem:[%s6014_s21 + $0x120] sm:$0xff] %v2863_v0  ;;  %v2795_v44 = vadd.f32 %v4768_v36, %v2794_v25  ;;  %v4774_v23 = vpop.eup %4773 }
 0x51a   : > { %2929 = vst [vmem:[%s6014_s21 + $0x128] sm:$0xff] %v2864_v22  ;;  %2930 = vst [vmem:[%s6014_s21 + $0x130] sm:$0xff] %v2865_v15  ;;  %v2819_v33 = vmul.f32 12.0, %v4774_v23 }
 0x51b   : > { %2931 = vst [vmem:[%s6014_s21 + $0x138] sm:$0xff] %v2866_v43  ;;  %2932 = vst [vmem:[%s6014_s21 + $0x140] sm:$0xff] %v2867_v39  ;;  %v2796_v37 = vadd.f32 %v4770_v19, %v2795_v44 }
 0x51c   : > { %2933 = vst [vmem:[%s6014_s21 + $0x148] sm:$0xff] %v2868_v27  ;;  %2934 = vst [vmem:[%s6014_s21 + $0x150] sm:$0xff] %v2869_v20 }
 0x51d   : > { %2935 = vst [vmem:[%s6014_s21 + $0x158] sm:$0xff] %v2870_v60  ;;  %2936 = vst [vmem:[%s6014_s21 + $0x160] sm:$0xff] %v2871_v16  ;;  %v2797_v28 = vadd.f32 %v4772_v17, %v2796_v37 }
 0x51e   : > { %2937 = vst [vmem:[%s6014_s21 + $0x168] sm:$0xff] %v2872_v52  ;;  %2938 = vst [vmem:[%s6014_s21 + $0x170] sm:$0xff] %v2873_v3 }
 0x51f   : > { %2939 = vst [vmem:[%s6014_s21 + $0x178] sm:$0xff] %v2874_v35  ;;  %v2798_v5 = vrot.slane %v2797_v28, 4 }
 0x521   : > { %v2799_v30 = vadd.f32 %v2798_v5, %v2797_v28 }
 0x523   : > { %v2800_v10 = vrot.slane %v2799_v30, 2 }
 0x525   : > { %v2801_v40 = vadd.f32 %v2800_v10, %v2799_v30 }
 0x527   : > { %v2802_v9 = vrot.slane %v2801_v40, 1 }
 0x529   : > { %v2803_v8 = vadd.f32 %v2802_v9, %v2801_v40 }
 0x52b   : > { %v2823_v53 = vsub.f32 %v2803_v8, %v2819_v33 }
 0x52d   : > { %4775 = vrcp.f32 %v2823_v53 }
 0x537   : > { %v4776_v2 = vpop.eup %4775 }
 0x538   : > { %v2876_v31 = vmul.f32 %v4776_v2, %v6228_v24  ;;  %v2877_v32 = vmul.f32 %v4776_v2, %v6234_v49  ;;  %v2878_v55 = vmul.f32 %v4776_v2, %v6245_v41  ;;  %v2879_v51 = vmul.f32 %v4776_v2, %v6251_v47 }
 0x539   : > { %v2880_v26 = vmul.f32 %v4776_v2, %v6257_v21  ;;  %v2881_v56 = vmul.f32 %v4776_v2, %v6263_v29  ;;  %v2882_v4 = vmul.f32 %v4776_v2, %v6269_v14  ;;  %v2883_v54 = vmul.f32 %v4776_v2, %v6272_v48 }
 0x53a   : > { %v2884_v11 = vmul.f32 %v4776_v2, %v6275_v18  ;;  %v2885_v24 = vmul.f32 %v4776_v2, %v6281_v12  ;;  %v2886_v49 = vmul.f32 %v4776_v2, %v6287_v42  ;;  %v2887_v41 = vmul.f32 %v4776_v2, %v6293_v45  ;;  %2940 = vst [vmem:[%s6014_s21 + $0x180] sm:$0xff] %v2876_v31 }
 0x53b   : > { %2941 = vst [vmem:[%s6014_s21 + $0x188] sm:$0xff] %v2877_v32  ;;  %2942 = vst [vmem:[%s6014_s21 + $0x190] sm:$0xff] %v2878_v55  ;;  %v2888_v47 = vmul.f32 %v4776_v2, %v6297_v59  ;;  %v2889_v21 = vmul.f32 %v4776_v2, %v4768_v36  ;;  %v2890_v29 = vmul.f32 %v4776_v2, %v4770_v19 }
 0x53c   : > { %2943 = vst [vmem:[%s6014_s21 + $0x198] sm:$0xff] %v2879_v51  ;;  %v2891_v14 = vmul.f32 %v4776_v2, %v4772_v17  ;;  %2944 = vst [vmem:[%s6014_s21 + $0x1a0] sm:$0xff] %v2880_v26 }
 0x53d   : > { %2945 = vst [vmem:[%s6014_s21 + $0x1a8] sm:$0xff] %v2881_v56  ;;  %2946 = vst [vmem:[%s6014_s21 + $0x1b0] sm:$0xff] %v2882_v4 }
 0x53e   : > { %2947 = vst [vmem:[%s6014_s21 + $0x1b8] sm:$0xff] %v2883_v54  ;;  %2948 = vst [vmem:[%s6014_s21 + $0x1c0] sm:$0xff] %v2884_v11 }
 0x53f   : > { %2949 = vst [vmem:[%s6014_s21 + $0x1c8] sm:$0xff] %v2885_v24  ;;  %2950 = vst [vmem:[%s6014_s21 + $0x1d0] sm:$0xff] %v2886_v49 }
 0x540   : > { %2951 = vst [vmem:[%s6014_s21 + $0x1d8] sm:$0xff] %v2887_v41  ;;  %2952 = vst [vmem:[%s6014_s21 + $0x1e0] sm:$0xff] %v2888_v47 }
 0x541   : > { %2953 = vst [vmem:[%s6014_s21 + $0x1e8] sm:$0xff] %v2889_v21  ;;  %2954 = vst [vmem:[%s6014_s21 + $0x1f0] sm:$0xff] %v2890_v29 }
 0x542   : > { %2955 = vst [vmem:[%s6014_s21 + $0x1f8] sm:$0xff] %v2891_v14 }
 0x543   : > { %4906 = shalt.err (!%p4903_p7)
}
 0x544   : > { %s4907_s0 = scalar_lea.hbm %s6353_s11, 8192  ;;  %s4911_s20 = scalar_lea.hbm %s6416_s4, 16384 }
 0x545   : > { %p4908_p9 = scmp.ne.s32.totalorder %s6353_s11, %s4907_s0  ;;  %p4912_p11 = scmp.lt.u32.totalorder %s6353_s11, %s6416_s4 }
 0x546   : > { %p4913_p2 = scmp.lt.u32.totalorder %s4911_s20, %s4907_s0  ;;  %p4915_p1 = scmp.lt.u32.totalorder %s4907_s0, %s6353_s11 }
 0x547   : > { %p4909_p0 = pnand %p4908_p9, %p6509_p13 }
 0x548   : > { %p4914_p12 = por %p4913_p2, %p4912_p11 }
 0x549   : > { %p4910_p8 = pneg %p4909_p0 }
 0x54a   : > { %p4916_p6 = por %p4915_p1, %p4914_p12 }
 0x54c   : > { %p4917_p10 = pnand %p4916_p6, %p4910_p8 }
 0x54e   : > { %4920 = shalt.err (!%p4917_p10)
}
 0x54f   : > { %s4980_s27 = smov 128   ;;  %s4981_s21 = smov 8  }
 0x550   : > { %4569 = dma.vmem_to_hbm [thread:$0]  (%p6509_p13), %s6355_s5, 8192, %s6353_s11, %s2957_s12, %s4980_s27, %s4980_s27, %s4981_s21  }
 0x551 PF: > { %s2986_s10 = sand.u32 1, %s4959_s15   ;;  %p6510_p4 = scmp.ne.s32.totalorder %s6446_s22, 0 }
 0x552   : > { %p6511_p5 = scmp.ge.s32.totalorder %s4971_s18, 2  ;;  %s2987_s19 = scalar_lea.sflag [#allocation4], %s2986_s10 }
 0x554   : > { %p4586_p3 = pnand %p6511_p5, %p6510_p4 }
 0x556   : > { %4954 = dma.done.wait (!%p4586_p3), %s2987_s19, 8192  }
 0x557   : > { %4956 = vsyncadd (!%p4586_p3), %s2987_s19, 4294959104  ;;  %p21_p7 = scmp.ge.s32.totalorder %s5123_s26, 4   ;;  %s6512_s15 = smov %s4963_s16 }
 0x558   : > { %s6513_s16 = smov %s4967_s17  ;;  %s6514_s17 = smov %s5139_s14 }
 0x559   : > { %s6515_s18 = smov %s5123_s26  ;;  %23 = sbr.rel (!%p21_p7) target bundleno = 10 (0xa), region = 102 }
 0x560   :  { %2992 = vsyncpa [#allocation3], 1 }
 0x561   :  { %2994 = vsyncpa [#allocation3 + $0x1], 1 }
 0x562   :  { %2995 = vsyncpa [#allocation6], 1 }
 0x563   :  { %2997 = vsyncpa [#allocation6 + $0x1], 1 }
 0x564   :  { %2998 = vsyncpa [#allocation9], 1 }
 0x565   :  { %2999 = vsyncpa [#allocation4], 1 }
 0x566   :  { %3001 = vsyncpa [#allocation4 + $0x1], 1 }

</bundles_post_ra>
